<compile_context>
chip_gen: v5e
topology: v5e:2x2
jax: 0.10.0
libtpu: 0.0.40
codegen_flags: <defaults>
</compile_context>

<pallas_src>
import functools

import jax
import jax.numpy as jnp
from jax.experimental import pallas as pl
from jax.experimental.pallas import tpu as pltpu


def _layernorm(y, gamma, beta, eps=1e-5):
    # f32 math; rsqrt lowers to the EUP slot.
    mu = jnp.mean(y, axis=-1, keepdims=True)
    var = jnp.mean((y - mu) ** 2, axis=-1, keepdims=True)
    return (y - mu) * jax.lax.rsqrt(var + eps) * gamma + beta


def _transformer_block_kernel(
    x_ref,
    wq_ref, bq_ref, wk_ref, bk_ref, wv_ref, bv_ref, wo_ref, bo_ref,
    g1_ref, be1_ref,
    w1_ref, bf1_ref, w2_ref, bf2_ref,
    g2_ref, be2_ref,
    o_ref,
    *, num_heads, compute_dtype, approx_recip,
):
    Bt, S, D = x_ref.shape
    dh = D // num_heads
    R = Bt * S
    scale = 1.0 / (dh ** 0.5)

    x = x_ref[...]                                   # (Bt, S, D) f32
    xr = x.reshape(R, D)                             # merge leading dims (layout-free)
    xr_c = xr.astype(compute_dtype)

    # ---- QKV projections: one MXU pass each with M = Bt*S rows ----
    q = jnp.dot(xr_c, wq_ref[...], preferred_element_type=jnp.float32) + bq_ref[...]
    k = jnp.dot(xr_c, wk_ref[...], preferred_element_type=jnp.float32) + bk_ref[...]
    v = jnp.dot(xr_c, wv_ref[...], preferred_element_type=jnp.float32) + bv_ref[...]

    q3 = (q * scale).reshape(Bt, S, D)               # fold 1/sqrt(dh) into q once
    k3 = k.reshape(Bt, S, D)
    v3 = v.reshape(Bt, S, D)

    # ---- multi-head attention (not masked), batched over Bt inside the block ----
    # concat_h(o_h) @ Wo  ==  sum_h  o_h @ Wo[h*dh:(h+1)*dh, :]
    # so the lane-dim concatenate is replaced by an accumulated projection and
    # Wo is only sliced along sublanes.
    # TODO(synk): for large S, tile this flash-style (query tiles parallel,
    # KV tiles arbitrary, online-softmax scratch) instead of (S, S) scores.
    attn = jnp.zeros((R, D), jnp.float32)
    for h in range(num_heads):
        lo, hi = h * dh, (h + 1) * dh
        qh = q3[:, :, lo:hi].astype(compute_dtype)   # (Bt, S, dh)
        kh = k3[:, :, lo:hi].astype(compute_dtype)
        vh = v3[:, :, lo:hi].astype(compute_dtype)
        s = jnp.einsum("bqd,bkd->bqk", qh, kh,
                       preferred_element_type=jnp.float32)        # (Bt, S, S)
        s = s - jnp.max(s, axis=-1, keepdims=True)
        p = jnp.exp(s)
        denom = jnp.sum(p, axis=-1, keepdims=True)
        if approx_recip:
            p = p * pl.reciprocal(denom, approx=True)   # EUP, off the VALU slots
        else:
            p = p / denom
        oh = jnp.einsum("bqk,bkd->bqd", p.astype(compute_dtype), vh,
                        preferred_element_type=jnp.float32)       # (Bt, S, dh)
        wo_h = wo_ref[lo:hi, :]                      # sublane slice of Wo (cheap)
        attn = attn + jnp.dot(oh.reshape(R, dh).astype(compute_dtype),
                              wo_h.astype(compute_dtype),
                              preferred_element_type=jnp.float32)
    attn = attn + bo_ref[...]

    # ---- residual + LayerNorm 1 (f32) ----
    h1 = _layernorm(attn + xr, g1_ref[...], be1_ref[...])

    # ---- feedforward: Linear(D,4D) -> ReLU -> Linear(4D,D), M = Bt*S rows ----
    # TODO(synk): for realistic D on v7x (64 MiB VMEM), tile w1/w2 along the 4D
    # hidden axis with an extra "arbitrary" grid axis and accumulate.
    ff = jnp.dot(h1.astype(compute_dtype), w1_ref[...],
                 preferred_element_type=jnp.float32) + bf1_ref[...]
    ff = jnp.maximum(ff, 0.0)
    ff = jnp.dot(ff.astype(compute_dtype), w2_ref[...],
                 preferred_element_type=jnp.float32) + bf2_ref[...]

    # ---- residual + LayerNorm 2 (f32) ----
    out = _layernorm(ff + h1, g2_ref[...], be2_ref[...])

    o_ref[...] = out.reshape(Bt, S, D).astype(o_ref.dtype)


def transformer_block(x, params, num_heads, *, compute_dtype=jnp.float32,
                      approx_recip=True, batch_tile=None, rows_target=256):
    """TransformerBlock forward as a single Pallas TPU kernel."""
    B, S, D = x.shape
    assert D % num_heads == 0

    if batch_tile is None:
        # Largest divisor of B that keeps ~rows_target rows (Bt*S) per grid step.
        want = max(1, -(-rows_target // S))          # cdiv(rows_target, S)
        batch_tile = 1
        for d in range(1, B + 1):
            if B % d == 0 and d <= want:
                batch_tile = d
    assert B % batch_tile == 0
    num_tiles = B // batch_tile
    # TODO(synk): on v7x (2 TensorCores) prefer a batch_tile that leaves >= 2
    # "parallel" grid steps so both cores get work.

    cd = jnp.dtype(compute_dtype)
    wcast = lambda w: w.astype(cd)   # only the big matrices; biases/LN stay f32

    weights = [
        wcast(params["wq"]), params["bq"], wcast(params["wk"]), params["bk"],
        wcast(params["wv"]), params["bv"], wcast(params["wo"]), params["bo"],
        params["g1"], params["be1"],
        wcast(params["w1"]), params["bf1"], wcast(params["w2"]), params["bf2"],
        params["g2"], params["be2"],
    ]

    def full_spec(arr):
        nd = arr.ndim
        # Constant index_map: the same weight block is reused every grid step.
        # TODO(synk): request single-buffering for these weight blocks
        # (pipeline_mode=pl.Buffered(1)) to avoid 2x weight VMEM at large D.
        return pl.BlockSpec(arr.shape, lambda b, _nd=nd: (0,) * _nd)

    kernel = functools.partial(
        _transformer_block_kernel,
        num_heads=num_heads, compute_dtype=cd, approx_recip=approx_recip,
    )

    # Explicit VMEM budget: weights (x2 buffering headroom) + activations.
    weight_bytes = sum(int(w.size) * w.dtype.itemsize for w in weights)
    act_bytes = batch_tile * S * (12 * D + num_heads * S) * 4
    vmem_limit = int(min(100 * 2 ** 20,
                         max(32 * 2 ** 20, 2 * (2 * weight_bytes + 4 * act_bytes))))

    return pl.pallas_call(
        kernel,
        out_shape=jax.ShapeDtypeStruct((B, S, D), x.dtype),
        grid_spec=pltpu.PrefetchScalarGridSpec(
            num_scalar_prefetch=0,
            grid=(num_tiles,),
            in_specs=[pl.BlockSpec((batch_tile, S, D), lambda b: (b, 0, 0))]
                     + [full_spec(w) for w in weights],
            # TODO(synk): for D < 128, pad D to 128 (or present the out block as
            # (batch_tile, S*D)) so the final store is a full-lane vst.
            out_specs=pl.BlockSpec((batch_tile, S, D), lambda b: (b, 0, 0)),
        ),
        compiler_params=pltpu.CompilerParams(
            dimension_semantics=("parallel",),
            vmem_limit_bytes=vmem_limit,
        ),
    )(x, *weights)


def transformer_block_ref(x, params, num_heads):
    """Plain-JAX f32 reference for correctness checking."""
    B, S, D = x.shape
    dh = D // num_heads
    q = x @ params["wq"] + params["bq"]
    k = x @ params["wk"] + params["bk"]
    v = x @ params["wv"] + params["bv"]
    q = q.reshape(B, S, num_heads, dh).transpose(0, 2, 1, 3)
    k = k.reshape(B, S, num_heads, dh).transpose(0, 2, 1, 3)
    v = v.reshape(B, S, num_heads, dh).transpose(0, 2, 1, 3)
    s = jnp.einsum("bhqd,bhkd->bhqk", q, k) / (dh ** 0.5)
    p = jax.nn.softmax(s, axis=-1)
    attn = jnp.einsum("bhqk,bhkd->bhqd", p, v).transpose(0, 2, 1, 3).reshape(B, S, D)
    attn = attn @ params["wo"] + params["bo"]

    def ln(y, g, b, eps=1e-5):
        mu = jnp.mean(y, axis=-1, keepdims=True)
        var = jnp.mean((y - mu) ** 2, axis=-1, keepdims=True)
        return (y - mu) / jnp.sqrt(var + eps) * g + b

    h1 = ln(attn + x, params["g1"], params["be1"])
    ff = jnp.maximum(h1 @ params["w1"] + params["bf1"], 0.0) @ params["w2"] + params["bf2"]
    return ln(ff + h1, params["g2"], params["be2"])


def init_params(key, D, num_heads):
    ks = jax.random.split(key, 10)
    sc = 0.05
    return {
        "wq": jax.random.normal(ks[0], (D, D), jnp.float32) * sc,
        "bq": jax.random.normal(ks[1], (1, D), jnp.float32) * sc,
        "wk": jax.random.normal(ks[2], (D, D), jnp.float32) * sc,
        "bk": jax.random.normal(ks[3], (1, D), jnp.float32) * sc,
        "wv": jax.random.normal(ks[4], (D, D), jnp.float32) * sc,
        "bv": jax.random.normal(ks[5], (1, D), jnp.float32) * sc,
        "wo": jax.random.normal(ks[6], (D, D), jnp.float32) * sc,
        "bo": jax.random.normal(ks[7], (1, D), jnp.float32) * sc,
        "g1": jnp.ones((1, D), jnp.float32),
        "be1": jnp.zeros((1, D), jnp.float32),
        "w1": jax.random.normal(ks[8], (D, 4 * D), jnp.float32) * sc,
        "bf1": jnp.zeros((1, 4 * D), jnp.float32),
        "w2": jax.random.normal(ks[9], (4 * D, D), jnp.float32) * sc,
        "bf2": jnp.zeros((1, D), jnp.float32),
        "g2": jnp.ones((1, D), jnp.float32),
        "be2": jnp.zeros((1, D), jnp.float32),
    }


if __name__ == "__main__":
    B, S, D, H = 2, 8, 32, 4   # batch, seq, dim_embeddings, num_heads
    key = jax.random.PRNGKey(0)
    kx, kp = jax.random.split(key)
    x = jax.random.normal(kx, (B, S, D), jnp.float32)
    params = init_params(kp, D, H)

    ref = transformer_block_ref(x, params, H)

    # Exact-precision path (f32 matmuls, exact softmax divide): tight check.
    out_f32 = jax.block_until_ready(
        transformer_block(x, params, H, compute_dtype=jnp.float32,
                          approx_recip=False))
    assert out_f32.shape == (B, S, D)
    assert jnp.allclose(out_f32, ref, atol=1e-4, rtol=1e-4), "f32 mismatch vs reference"

    # Fast path (bf16 MXU operands with f32 accumulation, EUP approx reciprocal
    # in the softmax): looser tolerance from the bf16 inputs.
    out_bf16 = jax.block_until_ready(
        transformer_block(x, params, H, compute_dtype=jnp.bfloat16,
                          approx_recip=True))
    assert out_bf16.shape == (B, S, D)
    assert jnp.allclose(out_bf16, ref, atol=5e-2, rtol=5e-2), "bf16 mismatch vs reference"

    print("KERNEL_OK")
</pallas_src>

<mosaic_0001>
module attributes {stable_mosaic.version = 11 : i64} {
  func.func @_transformer_block_kernel(%arg0: i32, %arg1: memref<2x8x32xf32, #tpu.memory_space<vmem>>, %arg2: memref<32x32xf32, #tpu.memory_space<vmem>>, %arg3: memref<1x32xf32, #tpu.memory_space<vmem>>, %arg4: memref<32x32xf32, #tpu.memory_space<vmem>>, %arg5: memref<1x32xf32, #tpu.memory_space<vmem>>, %arg6: memref<32x32xf32, #tpu.memory_space<vmem>>, %arg7: memref<1x32xf32, #tpu.memory_space<vmem>>, %arg8: memref<32x32xf32, #tpu.memory_space<vmem>>, %arg9: memref<1x32xf32, #tpu.memory_space<vmem>>, %arg10: memref<1x32xf32, #tpu.memory_space<vmem>>, %arg11: memref<1x32xf32, #tpu.memory_space<vmem>>, %arg12: memref<32x128xf32, #tpu.memory_space<vmem>>, %arg13: memref<1x128xf32, #tpu.memory_space<vmem>>, %arg14: memref<128x32xf32, #tpu.memory_space<vmem>>, %arg15: memref<1x32xf32, #tpu.memory_space<vmem>>, %arg16: memref<1x32xf32, #tpu.memory_space<vmem>>, %arg17: memref<1x32xf32, #tpu.memory_space<vmem>>, %arg18: memref<2x8x32xf32, #tpu.memory_space<vmem>>) attributes {dimension_semantics = [#tpu.dimension_semantics<parallel>], iteration_bounds = array<i64: 1>, scalar_prefetch = 0 : i64, scratch_operands = 0 : i64, tpu.core_type = #tpu.core_type<tc>, window_params = [{transform_indices = @transform_0, window_bounds = array<i64: 2, 8, 32>}, {pipeline_mode = #tpu.pipeline_mode<synchronous>, transform_indices = @transform_1, window_bounds = array<i64: 32, 32>}, {pipeline_mode = #tpu.pipeline_mode<synchronous>, transform_indices = @transform_2, window_bounds = array<i64: 1, 32>}, {pipeline_mode = #tpu.pipeline_mode<synchronous>, transform_indices = @transform_3, window_bounds = array<i64: 32, 32>}, {pipeline_mode = #tpu.pipeline_mode<synchronous>, transform_indices = @transform_4, window_bounds = array<i64: 1, 32>}, {pipeline_mode = #tpu.pipeline_mode<synchronous>, transform_indices = @transform_5, window_bounds = array<i64: 32, 32>}, {pipeline_mode = #tpu.pipeline_mode<synchronous>, transform_indices = @transform_6, window_bounds = array<i64: 1, 32>}, {pipeline_mode = #tpu.pipeline_mode<synchronous>, transform_indices = @transform_7, window_bounds = array<i64: 32, 32>}, {pipeline_mode = #tpu.pipeline_mode<synchronous>, transform_indices = @transform_8, window_bounds = array<i64: 1, 32>}, {pipeline_mode = #tpu.pipeline_mode<synchronous>, transform_indices = @transform_9, window_bounds = array<i64: 1, 32>}, {pipeline_mode = #tpu.pipeline_mode<synchronous>, transform_indices = @transform_10, window_bounds = array<i64: 1, 32>}, {pipeline_mode = #tpu.pipeline_mode<synchronous>, transform_indices = @transform_11, window_bounds = array<i64: 32, 128>}, {pipeline_mode = #tpu.pipeline_mode<synchronous>, transform_indices = @transform_12, window_bounds = array<i64: 1, 128>}, {pipeline_mode = #tpu.pipeline_mode<synchronous>, transform_indices = @transform_13, window_bounds = array<i64: 128, 32>}, {pipeline_mode = #tpu.pipeline_mode<synchronous>, transform_indices = @transform_14, window_bounds = array<i64: 1, 32>}, {pipeline_mode = #tpu.pipeline_mode<synchronous>, transform_indices = @transform_15, window_bounds = array<i64: 1, 32>}, {pipeline_mode = #tpu.pipeline_mode<synchronous>, transform_indices = @transform_16, window_bounds = array<i64: 1, 32>}, {transform_indices = @transform_17, window_bounds = array<i64: 2, 8, 32>}]} {
    %c0 = arith.constant 0 : index
    %c0_0 = arith.constant 0 : index
    %c0_1 = arith.constant 0 : index
    %0 = vector.load %arg1[%c0, %c0_0, %c0_1] : memref<2x8x32xf32, #tpu.memory_space<vmem>>, vector<2x8x32xf32>
    %1 = vector.shape_cast %0 : vector<2x8x32xf32> to vector<16x32xf32>
    %c0_2 = arith.constant 0 : index
    %c0_3 = arith.constant 0 : index
    %2 = vector.load %arg2[%c0_2, %c0_3] : memref<32x32xf32, #tpu.memory_space<vmem>>, vector<32x32xf32>
    %cst = arith.constant dense<0.000000e+00> : vector<16x32xf32>
    %3 = tpu.matmul %1, %2, %cst {dimension_numbers = #tpu.dot_dimension_numbers<[1], [0], [0], [1], [0, 0, 1, 1], [], []>} : vector<16x32xf32>, vector<32x32xf32>, vector<16x32xf32> -> vector<16x32xf32>
    %c0_4 = arith.constant 0 : index
    %c0_5 = arith.constant 0 : index
    %4 = vector.load %arg3[%c0_4, %c0_5] : memref<1x32xf32, #tpu.memory_space<vmem>>, vector<1x32xf32>
    %5 = vector.broadcast %4 : vector<1x32xf32> to vector<16x32xf32>
    %6 = arith.addf %3, %5 : vector<16x32xf32>
    %c0_6 = arith.constant 0 : index
    %c0_7 = arith.constant 0 : index
    %7 = vector.load %arg4[%c0_6, %c0_7] : memref<32x32xf32, #tpu.memory_space<vmem>>, vector<32x32xf32>
    %cst_8 = arith.constant dense<0.000000e+00> : vector<16x32xf32>
    %8 = tpu.matmul %1, %7, %cst_8 {dimension_numbers = #tpu.dot_dimension_numbers<[1], [0], [0], [1], [0, 0, 1, 1], [], []>} : vector<16x32xf32>, vector<32x32xf32>, vector<16x32xf32> -> vector<16x32xf32>
    %c0_9 = arith.constant 0 : index
    %c0_10 = arith.constant 0 : index
    %9 = vector.load %arg5[%c0_9, %c0_10] : memref<1x32xf32, #tpu.memory_space<vmem>>, vector<1x32xf32>
    %10 = vector.broadcast %9 : vector<1x32xf32> to vector<16x32xf32>
    %11 = arith.addf %8, %10 : vector<16x32xf32>
    %c0_11 = arith.constant 0 : index
    %c0_12 = arith.constant 0 : index
    %12 = vector.load %arg6[%c0_11, %c0_12] : memref<32x32xf32, #tpu.memory_space<vmem>>, vector<32x32xf32>
    %cst_13 = arith.constant dense<0.000000e+00> : vector<16x32xf32>
    %13 = tpu.matmul %1, %12, %cst_13 {dimension_numbers = #tpu.dot_dimension_numbers<[1], [0], [0], [1], [0, 0, 1, 1], [], []>} : vector<16x32xf32>, vector<32x32xf32>, vector<16x32xf32> -> vector<16x32xf32>
    %c0_14 = arith.constant 0 : index
    %c0_15 = arith.constant 0 : index
    %14 = vector.load %arg7[%c0_14, %c0_15] : memref<1x32xf32, #tpu.memory_space<vmem>>, vector<1x32xf32>
    %15 = vector.broadcast %14 : vector<1x32xf32> to vector<16x32xf32>
    %16 = arith.addf %13, %15 : vector<16x32xf32>
    %cst_16 = arith.constant 0.353553385 : f32
    %17 = vector.broadcast %cst_16 : f32 to vector<16x32xf32>
    %18 = arith.mulf %6, %17 : vector<16x32xf32>
    %19 = vector.shape_cast %18 : vector<16x32xf32> to vector<2x8x32xf32>
    %20 = vector.shape_cast %11 : vector<16x32xf32> to vector<2x8x32xf32>
    %21 = vector.shape_cast %16 : vector<16x32xf32> to vector<2x8x32xf32>
    %cst_17 = arith.constant 0.000000e+00 : f32
    %22 = vector.broadcast %cst_17 : f32 to vector<16x32xf32>
    %23 = vector.extract_strided_slice %19 {offsets = [0, 0, 0], sizes = [2, 8, 8], strides = [1, 1, 1]} : vector<2x8x32xf32> to vector<2x8x8xf32>
    %24 = vector.extract_strided_slice %20 {offsets = [0, 0, 0], sizes = [2, 8, 8], strides = [1, 1, 1]} : vector<2x8x32xf32> to vector<2x8x8xf32>
    %25 = vector.extract_strided_slice %21 {offsets = [0, 0, 0], sizes = [2, 8, 8], strides = [1, 1, 1]} : vector<2x8x32xf32> to vector<2x8x8xf32>
    "tpu.trace_start"() <{level = 10 : i32, message = "bqd,bkd->bqk"}> : () -> ()
    %cst_18 = arith.constant dense<0.000000e+00> : vector<2x8x8xf32>
    %26 = tpu.matmul %23, %24, %cst_18 {dimension_numbers = #tpu.dot_dimension_numbers<[2], [2], [1], [1], [0, 0, 0, 1, 1, 1], [0], [0]>} : vector<2x8x8xf32>, vector<2x8x8xf32>, vector<2x8x8xf32> -> vector<2x8x8xf32>
    "tpu.trace_stop"() : () -> ()
    %cst_19 = arith.constant dense<0xFF800000> : vector<2x8xf32>
    %27 = vector.multi_reduction <maximumf>, %26, %cst_19 [2] : vector<2x8x8xf32> to vector<2x8xf32>
    %28 = vector.shape_cast %27 : vector<2x8xf32> to vector<2x8x1xf32>
    %29 = vector.broadcast %28 : vector<2x8x1xf32> to vector<2x8x8xf32>
    %30 = arith.subf %26, %29 : vector<2x8x8xf32>
    %31 = math.exp %30 : vector<2x8x8xf32>
    %cst_20 = arith.constant dense<0.000000e+00> : vector<2x8xf32>
    %32 = vector.multi_reduction <add>, %31, %cst_20 [2] : vector<2x8x8xf32> to vector<2x8xf32>
    %33 = vector.shape_cast %32 : vector<2x8xf32> to vector<2x8x1xf32>
    %34 = vector.broadcast %33 : vector<2x8x1xf32> to vector<2x8x8xf32>
    %35 = arith.divf %31, %34 : vector<2x8x8xf32>
    "tpu.trace_start"() <{level = 10 : i32, message = "bqk,bkd->bqd"}> : () -> ()
    %cst_21 = arith.constant dense<0.000000e+00> : vector<2x8x8xf32>
    %36 = tpu.matmul %35, %25, %cst_21 {dimension_numbers = #tpu.dot_dimension_numbers<[2], [1], [1], [2], [0, 0, 0, 1, 1, 2], [0], [0]>} : vector<2x8x8xf32>, vector<2x8x8xf32>, vector<2x8x8xf32> -> vector<2x8x8xf32>
    "tpu.trace_stop"() : () -> ()
    %c0_22 = arith.constant 0 : index
    %c0_23 = arith.constant 0 : index
    %37 = vector.load %arg8[%c0_22, %c0_23] : memref<32x32xf32, #tpu.memory_space<vmem>>, vector<8x32xf32>
    %38 = vector.shape_cast %36 : vector<2x8x8xf32> to vector<16x8xf32>
    %cst_24 = arith.constant dense<0.000000e+00> : vector<16x32xf32>
    %39 = tpu.matmul %38, %37, %cst_24 {dimension_numbers = #tpu.dot_dimension_numbers<[1], [0], [0], [1], [0, 0, 1, 1], [], []>} : vector<16x8xf32>, vector<8x32xf32>, vector<16x32xf32> -> vector<16x32xf32>
    %40 = arith.addf %22, %39 : vector<16x32xf32>
    %41 = vector.extract_strided_slice %19 {offsets = [0, 0, 8], sizes = [2, 8, 8], strides = [1, 1, 1]} : vector<2x8x32xf32> to vector<2x8x8xf32>
    %42 = vector.extract_strided_slice %20 {offsets = [0, 0, 8], sizes = [2, 8, 8], strides = [1, 1, 1]} : vector<2x8x32xf32> to vector<2x8x8xf32>
    %43 = vector.extract_strided_slice %21 {offsets = [0, 0, 8], sizes = [2, 8, 8], strides = [1, 1, 1]} : vector<2x8x32xf32> to vector<2x8x8xf32>
    "tpu.trace_start"() <{level = 10 : i32, message = "bqd,bkd->bqk"}> : () -> ()
    %cst_25 = arith.constant dense<0.000000e+00> : vector<2x8x8xf32>
    %44 = tpu.matmul %41, %42, %cst_25 {dimension_numbers = #tpu.dot_dimension_numbers<[2], [2], [1], [1], [0, 0, 0, 1, 1, 1], [0], [0]>} : vector<2x8x8xf32>, vector<2x8x8xf32>, vector<2x8x8xf32> -> vector<2x8x8xf32>
    "tpu.trace_stop"() : () -> ()
    %cst_26 = arith.constant dense<0xFF800000> : vector<2x8xf32>
    %45 = vector.multi_reduction <maximumf>, %44, %cst_26 [2] : vector<2x8x8xf32> to vector<2x8xf32>
    %46 = vector.shape_cast %45 : vector<2x8xf32> to vector<2x8x1xf32>
    %47 = vector.broadcast %46 : vector<2x8x1xf32> to vector<2x8x8xf32>
    %48 = arith.subf %44, %47 : vector<2x8x8xf32>
    %49 = math.exp %48 : vector<2x8x8xf32>
    %cst_27 = arith.constant dense<0.000000e+00> : vector<2x8xf32>
    %50 = vector.multi_reduction <add>, %49, %cst_27 [2] : vector<2x8x8xf32> to vector<2x8xf32>
    %51 = vector.shape_cast %50 : vector<2x8xf32> to vector<2x8x1xf32>
    %52 = vector.broadcast %51 : vector<2x8x1xf32> to vector<2x8x8xf32>
    %53 = arith.divf %49, %52 : vector<2x8x8xf32>
    "tpu.trace_start"() <{level = 10 : i32, message = "bqk,bkd->bqd"}> : () -> ()
    %cst_28 = arith.constant dense<0.000000e+00> : vector<2x8x8xf32>
    %54 = tpu.matmul %53, %43, %cst_28 {dimension_numbers = #tpu.dot_dimension_numbers<[2], [1], [1], [2], [0, 0, 0, 1, 1, 2], [0], [0]>} : vector<2x8x8xf32>, vector<2x8x8xf32>, vector<2x8x8xf32> -> vector<2x8x8xf32>
    "tpu.trace_stop"() : () -> ()
    %c8 = arith.constant 8 : index
    %c0_29 = arith.constant 0 : index
    %55 = vector.load %arg8[%c8, %c0_29] : memref<32x32xf32, #tpu.memory_space<vmem>>, vector<8x32xf32>
    %56 = vector.shape_cast %54 : vector<2x8x8xf32> to vector<16x8xf32>
    %cst_30 = arith.constant dense<0.000000e+00> : vector<16x32xf32>
    %57 = tpu.matmul %56, %55, %cst_30 {dimension_numbers = #tpu.dot_dimension_numbers<[1], [0], [0], [1], [0, 0, 1, 1], [], []>} : vector<16x8xf32>, vector<8x32xf32>, vector<16x32xf32> -> vector<16x32xf32>
    %58 = arith.addf %40, %57 : vector<16x32xf32>
    %59 = vector.extract_strided_slice %19 {offsets = [0, 0, 16], sizes = [2, 8, 8], strides = [1, 1, 1]} : vector<2x8x32xf32> to vector<2x8x8xf32>
    %60 = vector.extract_strided_slice %20 {offsets = [0, 0, 16], sizes = [2, 8, 8], strides = [1, 1, 1]} : vector<2x8x32xf32> to vector<2x8x8xf32>
    %61 = vector.extract_strided_slice %21 {offsets = [0, 0, 16], sizes = [2, 8, 8], strides = [1, 1, 1]} : vector<2x8x32xf32> to vector<2x8x8xf32>
    "tpu.trace_start"() <{level = 10 : i32, message = "bqd,bkd->bqk"}> : () -> ()
    %cst_31 = arith.constant dense<0.000000e+00> : vector<2x8x8xf32>
    %62 = tpu.matmul %59, %60, %cst_31 {dimension_numbers = #tpu.dot_dimension_numbers<[2], [2], [1], [1], [0, 0, 0, 1, 1, 1], [0], [0]>} : vector<2x8x8xf32>, vector<2x8x8xf32>, vector<2x8x8xf32> -> vector<2x8x8xf32>
    "tpu.trace_stop"() : () -> ()
    %cst_32 = arith.constant dense<0xFF800000> : vector<2x8xf32>
    %63 = vector.multi_reduction <maximumf>, %62, %cst_32 [2] : vector<2x8x8xf32> to vector<2x8xf32>
    %64 = vector.shape_cast %63 : vector<2x8xf32> to vector<2x8x1xf32>
    %65 = vector.broadcast %64 : vector<2x8x1xf32> to vector<2x8x8xf32>
    %66 = arith.subf %62, %65 : vector<2x8x8xf32>
    %67 = math.exp %66 : vector<2x8x8xf32>
    %cst_33 = arith.constant dense<0.000000e+00> : vector<2x8xf32>
    %68 = vector.multi_reduction <add>, %67, %cst_33 [2] : vector<2x8x8xf32> to vector<2x8xf32>
    %69 = vector.shape_cast %68 : vector<2x8xf32> to vector<2x8x1xf32>
    %70 = vector.broadcast %69 : vector<2x8x1xf32> to vector<2x8x8xf32>
    %71 = arith.divf %67, %70 : vector<2x8x8xf32>
    "tpu.trace_start"() <{level = 10 : i32, message = "bqk,bkd->bqd"}> : () -> ()
    %cst_34 = arith.constant dense<0.000000e+00> : vector<2x8x8xf32>
    %72 = tpu.matmul %71, %61, %cst_34 {dimension_numbers = #tpu.dot_dimension_numbers<[2], [1], [1], [2], [0, 0, 0, 1, 1, 2], [0], [0]>} : vector<2x8x8xf32>, vector<2x8x8xf32>, vector<2x8x8xf32> -> vector<2x8x8xf32>
    "tpu.trace_stop"() : () -> ()
    %c16 = arith.constant 16 : index
    %c0_35 = arith.constant 0 : index
    %73 = vector.load %arg8[%c16, %c0_35] : memref<32x32xf32, #tpu.memory_space<vmem>>, vector<8x32xf32>
    %74 = vector.shape_cast %72 : vector<2x8x8xf32> to vector<16x8xf32>
    %cst_36 = arith.constant dense<0.000000e+00> : vector<16x32xf32>
    %75 = tpu.matmul %74, %73, %cst_36 {dimension_numbers = #tpu.dot_dimension_numbers<[1], [0], [0], [1], [0, 0, 1, 1], [], []>} : vector<16x8xf32>, vector<8x32xf32>, vector<16x32xf32> -> vector<16x32xf32>
    %76 = arith.addf %58, %75 : vector<16x32xf32>
    %77 = vector.extract_strided_slice %19 {offsets = [0, 0, 24], sizes = [2, 8, 8], strides = [1, 1, 1]} : vector<2x8x32xf32> to vector<2x8x8xf32>
    %78 = vector.extract_strided_slice %20 {offsets = [0, 0, 24], sizes = [2, 8, 8], strides = [1, 1, 1]} : vector<2x8x32xf32> to vector<2x8x8xf32>
    %79 = vector.extract_strided_slice %21 {offsets = [0, 0, 24], sizes = [2, 8, 8], strides = [1, 1, 1]} : vector<2x8x32xf32> to vector<2x8x8xf32>
    "tpu.trace_start"() <{level = 10 : i32, message = "bqd,bkd->bqk"}> : () -> ()
    %cst_37 = arith.constant dense<0.000000e+00> : vector<2x8x8xf32>
    %80 = tpu.matmul %77, %78, %cst_37 {dimension_numbers = #tpu.dot_dimension_numbers<[2], [2], [1], [1], [0, 0, 0, 1, 1, 1], [0], [0]>} : vector<2x8x8xf32>, vector<2x8x8xf32>, vector<2x8x8xf32> -> vector<2x8x8xf32>
    "tpu.trace_stop"() : () -> ()
    %cst_38 = arith.constant dense<0xFF800000> : vector<2x8xf32>
    %81 = vector.multi_reduction <maximumf>, %80, %cst_38 [2] : vector<2x8x8xf32> to vector<2x8xf32>
    %82 = vector.shape_cast %81 : vector<2x8xf32> to vector<2x8x1xf32>
    %83 = vector.broadcast %82 : vector<2x8x1xf32> to vector<2x8x8xf32>
    %84 = arith.subf %80, %83 : vector<2x8x8xf32>
    %85 = math.exp %84 : vector<2x8x8xf32>
    %cst_39 = arith.constant dense<0.000000e+00> : vector<2x8xf32>
    %86 = vector.multi_reduction <add>, %85, %cst_39 [2] : vector<2x8x8xf32> to vector<2x8xf32>
    %87 = vector.shape_cast %86 : vector<2x8xf32> to vector<2x8x1xf32>
    %88 = vector.broadcast %87 : vector<2x8x1xf32> to vector<2x8x8xf32>
    %89 = arith.divf %85, %88 : vector<2x8x8xf32>
    "tpu.trace_start"() <{level = 10 : i32, message = "bqk,bkd->bqd"}> : () -> ()
    %cst_40 = arith.constant dense<0.000000e+00> : vector<2x8x8xf32>
    %90 = tpu.matmul %89, %79, %cst_40 {dimension_numbers = #tpu.dot_dimension_numbers<[2], [1], [1], [2], [0, 0, 0, 1, 1, 2], [0], [0]>} : vector<2x8x8xf32>, vector<2x8x8xf32>, vector<2x8x8xf32> -> vector<2x8x8xf32>
    "tpu.trace_stop"() : () -> ()
    %c24 = arith.constant 24 : index
    %c0_41 = arith.constant 0 : index
    %91 = vector.load %arg8[%c24, %c0_41] : memref<32x32xf32, #tpu.memory_space<vmem>>, vector<8x32xf32>
    %92 = vector.shape_cast %90 : vector<2x8x8xf32> to vector<16x8xf32>
    %cst_42 = arith.constant dense<0.000000e+00> : vector<16x32xf32>
    %93 = tpu.matmul %92, %91, %cst_42 {dimension_numbers = #tpu.dot_dimension_numbers<[1], [0], [0], [1], [0, 0, 1, 1], [], []>} : vector<16x8xf32>, vector<8x32xf32>, vector<16x32xf32> -> vector<16x32xf32>
    %94 = arith.addf %76, %93 : vector<16x32xf32>
    %c0_43 = arith.constant 0 : index
    %c0_44 = arith.constant 0 : index
    %95 = vector.load %arg9[%c0_43, %c0_44] : memref<1x32xf32, #tpu.memory_space<vmem>>, vector<1x32xf32>
    %96 = vector.broadcast %95 : vector<1x32xf32> to vector<16x32xf32>
    %97 = arith.addf %94, %96 : vector<16x32xf32>
    %98 = arith.addf %97, %1 : vector<16x32xf32>
    %c0_45 = arith.constant 0 : index
    %c0_46 = arith.constant 0 : index
    %99 = vector.load %arg10[%c0_45, %c0_46] : memref<1x32xf32, #tpu.memory_space<vmem>>, vector<1x32xf32>
    %c0_47 = arith.constant 0 : index
    %c0_48 = arith.constant 0 : index
    %100 = vector.load %arg11[%c0_47, %c0_48] : memref<1x32xf32, #tpu.memory_space<vmem>>, vector<1x32xf32>
    %cst_49 = arith.constant dense<0.000000e+00> : vector<16xf32>
    %101 = vector.multi_reduction <add>, %98, %cst_49 [1] : vector<16x32xf32> to vector<16xf32>
    %102 = vector.shape_cast %101 : vector<16xf32> to vector<16x1xf32>
    %cst_50 = arith.constant 3.200000e+01 : f32
    %103 = vector.broadcast %cst_50 : f32 to vector<16x1xf32>
    %104 = arith.divf %102, %103 : vector<16x1xf32>
    %105 = vector.broadcast %104 : vector<16x1xf32> to vector<16x32xf32>
    %106 = arith.subf %98, %105 : vector<16x32xf32>
    %107 = arith.mulf %106, %106 : vector<16x32xf32>
    %cst_51 = arith.constant dense<0.000000e+00> : vector<16xf32>
    %108 = vector.multi_reduction <add>, %107, %cst_51 [1] : vector<16x32xf32> to vector<16xf32>
    %109 = vector.shape_cast %108 : vector<16xf32> to vector<16x1xf32>
    %cst_52 = arith.constant 3.200000e+01 : f32
    %110 = vector.broadcast %cst_52 : f32 to vector<16x1xf32>
    %111 = arith.divf %109, %110 : vector<16x1xf32>
    %112 = vector.broadcast %104 : vector<16x1xf32> to vector<16x32xf32>
    %113 = arith.subf %98, %112 : vector<16x32xf32>
    %cst_53 = arith.constant 9.99999974E-6 : f32
    %114 = vector.broadcast %cst_53 : f32 to vector<16x1xf32>
    %115 = arith.addf %111, %114 : vector<16x1xf32>
    %116 = math.rsqrt %115 : vector<16x1xf32>
    %117 = vector.broadcast %116 : vector<16x1xf32> to vector<16x32xf32>
    %118 = arith.mulf %113, %117 : vector<16x32xf32>
    %119 = vector.broadcast %99 : vector<1x32xf32> to vector<16x32xf32>
    %120 = arith.mulf %118, %119 : vector<16x32xf32>
    %121 = vector.broadcast %100 : vector<1x32xf32> to vector<16x32xf32>
    %122 = arith.addf %120, %121 : vector<16x32xf32>
    %c0_54 = arith.constant 0 : index
    %c0_55 = arith.constant 0 : index
    %123 = vector.load %arg12[%c0_54, %c0_55] : memref<32x128xf32, #tpu.memory_space<vmem>>, vector<32x128xf32>
    %cst_56 = arith.constant dense<0.000000e+00> : vector<16x128xf32>
    %124 = tpu.matmul %122, %123, %cst_56 {dimension_numbers = #tpu.dot_dimension_numbers<[1], [0], [0], [1], [0, 0, 1, 1], [], []>} : vector<16x32xf32>, vector<32x128xf32>, vector<16x128xf32> -> vector<16x128xf32>
    %c0_57 = arith.constant 0 : index
    %c0_58 = arith.constant 0 : index
    %125 = vector.load %arg13[%c0_57, %c0_58] : memref<1x128xf32, #tpu.memory_space<vmem>>, vector<1x128xf32>
    %126 = vector.broadcast %125 : vector<1x128xf32> to vector<16x128xf32>
    %127 = arith.addf %124, %126 : vector<16x128xf32>
    %cst_59 = arith.constant 0.000000e+00 : f32
    %128 = vector.broadcast %cst_59 : f32 to vector<16x128xf32>
    %129 = arith.maximumf %127, %128 : vector<16x128xf32>
    %c0_60 = arith.constant 0 : index
    %c0_61 = arith.constant 0 : index
    %130 = vector.load %arg14[%c0_60, %c0_61] : memref<128x32xf32, #tpu.memory_space<vmem>>, vector<128x32xf32>
    %cst_62 = arith.constant dense<0.000000e+00> : vector<16x32xf32>
    %131 = tpu.matmul %129, %130, %cst_62 {dimension_numbers = #tpu.dot_dimension_numbers<[1], [0], [0], [1], [0, 0, 1, 1], [], []>} : vector<16x128xf32>, vector<128x32xf32>, vector<16x32xf32> -> vector<16x32xf32>
    %c0_63 = arith.constant 0 : index
    %c0_64 = arith.constant 0 : index
    %132 = vector.load %arg15[%c0_63, %c0_64] : memref<1x32xf32, #tpu.memory_space<vmem>>, vector<1x32xf32>
    %133 = vector.broadcast %132 : vector<1x32xf32> to vector<16x32xf32>
    %134 = arith.addf %131, %133 : vector<16x32xf32>
    %135 = arith.addf %134, %122 : vector<16x32xf32>
    %c0_65 = arith.constant 0 : index
    %c0_66 = arith.constant 0 : index
    %136 = vector.load %arg16[%c0_65, %c0_66] : memref<1x32xf32, #tpu.memory_space<vmem>>, vector<1x32xf32>
    %c0_67 = arith.constant 0 : index
    %c0_68 = arith.constant 0 : index
    %137 = vector.load %arg17[%c0_67, %c0_68] : memref<1x32xf32, #tpu.memory_space<vmem>>, vector<1x32xf32>
    %cst_69 = arith.constant dense<0.000000e+00> : vector<16xf32>
    %138 = vector.multi_reduction <add>, %135, %cst_69 [1] : vector<16x32xf32> to vector<16xf32>
    %139 = vector.shape_cast %138 : vector<16xf32> to vector<16x1xf32>
    %cst_70 = arith.constant 3.200000e+01 : f32
    %140 = vector.broadcast %cst_70 : f32 to vector<16x1xf32>
    %141 = arith.divf %139, %140 : vector<16x1xf32>
    %142 = vector.broadcast %141 : vector<16x1xf32> to vector<16x32xf32>
    %143 = arith.subf %135, %142 : vector<16x32xf32>
    %144 = arith.mulf %143, %143 : vector<16x32xf32>
    %cst_71 = arith.constant dense<0.000000e+00> : vector<16xf32>
    %145 = vector.multi_reduction <add>, %144, %cst_71 [1] : vector<16x32xf32> to vector<16xf32>
    %146 = vector.shape_cast %145 : vector<16xf32> to vector<16x1xf32>
    %cst_72 = arith.constant 3.200000e+01 : f32
    %147 = vector.broadcast %cst_72 : f32 to vector<16x1xf32>
    %148 = arith.divf %146, %147 : vector<16x1xf32>
    %149 = vector.broadcast %141 : vector<16x1xf32> to vector<16x32xf32>
    %150 = arith.subf %135, %149 : vector<16x32xf32>
    %cst_73 = arith.constant 9.99999974E-6 : f32
    %151 = vector.broadcast %cst_73 : f32 to vector<16x1xf32>
    %152 = arith.addf %148, %151 : vector<16x1xf32>
    %153 = math.rsqrt %152 : vector<16x1xf32>
    %154 = vector.broadcast %153 : vector<16x1xf32> to vector<16x32xf32>
    %155 = arith.mulf %150, %154 : vector<16x32xf32>
    %156 = vector.broadcast %136 : vector<1x32xf32> to vector<16x32xf32>
    %157 = arith.mulf %155, %156 : vector<16x32xf32>
    %158 = vector.broadcast %137 : vector<1x32xf32> to vector<16x32xf32>
    %159 = arith.addf %157, %158 : vector<16x32xf32>
    %160 = vector.shape_cast %159 : vector<16x32xf32> to vector<2x8x32xf32>
    %c0_74 = arith.constant 0 : index
    %c0_75 = arith.constant 0 : index
    %c0_76 = arith.constant 0 : index
    %161 = vector.load %arg18[%c0_74, %c0_75, %c0_76] : memref<2x8x32xf32, #tpu.memory_space<vmem>>, vector<2x8x32xf32>
    tpu.vector_store %arg18[%c0_74, %c0_75, %c0_76], %160 {strides = array<i32>} : memref<2x8x32xf32, #tpu.memory_space<vmem>>, vector<2x8x32xf32>,
    return
  }
  func.func @transform_0(%arg0: i32) -> (i32, i32, i32) {
    %c0_i32 = arith.constant 0 : i32
    %c0_i32_0 = arith.constant 0 : i32
    %c0_i32_1 = arith.constant 0 : i32
    return %arg0, %c0_i32, %c0_i32_0 : i32, i32, i32
  }
  func.func @transform_1(%arg0: i32) -> (i32, i32) {
    %c0_i32 = arith.constant 0 : i32
    %c0_i32_0 = arith.constant 0 : i32
    %c0_i32_1 = arith.constant 0 : i32
    return %c0_i32, %c0_i32_0 : i32, i32
  }
  func.func @transform_2(%arg0: i32) -> (i32, i32) {
    %c0_i32 = arith.constant 0 : i32
    %c0_i32_0 = arith.constant 0 : i32
    %c0_i32_1 = arith.constant 0 : i32
    return %c0_i32, %c0_i32_0 : i32, i32
  }
  func.func @transform_3(%arg0: i32) -> (i32, i32) {
    %c0_i32 = arith.constant 0 : i32
    %c0_i32_0 = arith.constant 0 : i32
    %c0_i32_1 = arith.constant 0 : i32
    return %c0_i32, %c0_i32_0 : i32, i32
  }
  func.func @transform_4(%arg0: i32) -> (i32, i32) {
    %c0_i32 = arith.constant 0 : i32
    %c0_i32_0 = arith.constant 0 : i32
    %c0_i32_1 = arith.constant 0 : i32
    return %c0_i32, %c0_i32_0 : i32, i32
  }
  func.func @transform_5(%arg0: i32) -> (i32, i32) {
    %c0_i32 = arith.constant 0 : i32
    %c0_i32_0 = arith.constant 0 : i32
    %c0_i32_1 = arith.constant 0 : i32
    return %c0_i32, %c0_i32_0 : i32, i32
  }
  func.func @transform_6(%arg0: i32) -> (i32, i32) {
    %c0_i32 = arith.constant 0 : i32
    %c0_i32_0 = arith.constant 0 : i32
    %c0_i32_1 = arith.constant 0 : i32
    return %c0_i32, %c0_i32_0 : i32, i32
  }
  func.func @transform_7(%arg0: i32) -> (i32, i32) {
    %c0_i32 = arith.constant 0 : i32
    %c0_i32_0 = arith.constant 0 : i32
    %c0_i32_1 = arith.constant 0 : i32
    return %c0_i32, %c0_i32_0 : i32, i32
  }
  func.func @transform_8(%arg0: i32) -> (i32, i32) {
    %c0_i32 = arith.constant 0 : i32
    %c0_i32_0 = arith.constant 0 : i32
    %c0_i32_1 = arith.constant 0 : i32
    return %c0_i32, %c0_i32_0 : i32, i32
  }
  func.func @transform_9(%arg0: i32) -> (i32, i32) {
    %c0_i32 = arith.constant 0 : i32
    %c0_i32_0 = arith.constant 0 : i32
    %c0_i32_1 = arith.constant 0 : i32
    return %c0_i32, %c0_i32_0 : i32, i32
  }
  func.func @transform_10(%arg0: i32) -> (i32, i32) {
    %c0_i32 = arith.constant 0 : i32
    %c0_i32_0 = arith.constant 0 : i32
    %c0_i32_1 = arith.constant 0 : i32
    return %c0_i32, %c0_i32_0 : i32, i32
  }
  func.func @transform_11(%arg0: i32) -> (i32, i32) {
    %c0_i32 = arith.constant 0 : i32
    %c0_i32_0 = arith.constant 0 : i32
    %c0_i32_1 = arith.constant 0 : i32
    return %c0_i32, %c0_i32_0 : i32, i32
  }
  func.func @transform_12(%arg0: i32) -> (i32, i32) {
    %c0_i32 = arith.constant 0 : i32
    %c0_i32_0 = arith.constant 0 : i32
    %c0_i32_1 = arith.constant 0 : i32
    return %c0_i32, %c0_i32_0 : i32, i32
  }
  func.func @transform_13(%arg0: i32) -> (i32, i32) {
    %c0_i32 = arith.constant 0 : i32
    %c0_i32_0 = arith.constant 0 : i32
    %c0_i32_1 = arith.constant 0 : i32
    return %c0_i32, %c0_i32_0 : i32, i32
  }
  func.func @transform_14(%arg0: i32) -> (i32, i32) {
    %c0_i32 = arith.constant 0 : i32
    %c0_i32_0 = arith.constant 0 : i32
    %c0_i32_1 = arith.constant 0 : i32
    return %c0_i32, %c0_i32_0 : i32, i32
  }
  func.func @transform_15(%arg0: i32) -> (i32, i32) {
    %c0_i32 = arith.constant 0 : i32
    %c0_i32_0 = arith.constant 0 : i32
    %c0_i32_1 = arith.constant 0 : i32
    return %c0_i32, %c0_i32_0 : i32, i32
  }
  func.func @transform_16(%arg0: i32) -> (i32, i32) {
    %c0_i32 = arith.constant 0 : i32
    %c0_i32_0 = arith.constant 0 : i32
    %c0_i32_1 = arith.constant 0 : i32
    return %c0_i32, %c0_i32_0 : i32, i32
  }
  func.func @transform_17(%arg0: i32) -> (i32, i32, i32) {
    %c0_i32 = arith.constant 0 : i32
    %c0_i32_0 = arith.constant 0 : i32
    %c0_i32_1 = arith.constant 0 : i32
    return %arg0, %c0_i32, %c0_i32_0 : i32, i32, i32
  }
}

</mosaic_0001>

<bundles_post_ra>
// kernel: tpu_custom_call.1
= control target key start
LH: loop header
LB: loop body
LE: loop exit
PB: predicated region body
PF: predicated region fallthrough
CT: control target
= control target key end

     0   :  { %s1711_s0 = inlined_call_operand.hbm [shape: f32[2,8,32], index: 0, kind: input, shape index: {}]   ;;  %s1712_s1 = inlined_call_operand.vmem [shape: f32[32,32], index: 1, kind: input, shape index: {}]   ;;  %s1713_s2 = inlined_call_operand.vmem [shape: f32[1,32], index: 2, kind: input, shape index: {}]   ;;  %s1714_s3 = inlined_call_operand.vmem [shape: f32[32,32], index: 3, kind: input, shape index: {}]   ;;  %s1715_s4 = inlined_call_operand.vmem [shape: f32[1,32], index: 4, kind: input, shape index: {}]   ;;  %s1716_s5 = inlined_call_operand.vmem [shape: f32[32,32], index: 5, kind: input, shape index: {}]   ;;  %s1717_s6 = inlined_call_operand.vmem [shape: f32[1,32], index: 6, kind: input, shape index: {}]   ;;  %s1718_s7 = inlined_call_operand.vmem [shape: f32[32,32], index: 7, kind: input, shape index: {}]   ;;  %s1719_s8 = inlined_call_operand.vmem [shape: f32[1,32], index: 8, kind: input, shape index: {}]   ;;  %s1720_s9 = inlined_call_operand.vmem [shape: f32[1,32], index: 9, kind: input, shape index: {}]   ;;  %s1721_s10 = inlined_call_operand.vmem [shape: f32[1,32], index: 10, kind: input, shape index: {}]   ;;  %s1722_s11 = inlined_call_operand.vmem [shape: f32[32,128], index: 11, kind: input, shape index: {}]   ;;  %s1723_s12 = inlined_call_operand.vmem [shape: f32[1,128], index: 12, kind: input, shape index: {}]   ;;  %s1724_s13 = inlined_call_operand.vmem [shape: f32[128,32], index: 13, kind: input, shape index: {}]   ;;  %s1725_s14 = inlined_call_operand.vmem [shape: f32[1,32], index: 14, kind: input, shape index: {}]   ;;  %s1726_s15 = inlined_call_operand.vmem [shape: f32[1,32], index: 15, kind: input, shape index: {}]   ;;  %s1727_s16 = inlined_call_operand.vmem [shape: f32[1,32], index: 16, kind: input, shape index: {}]   ;;  %s1728_s17 = inlined_call_operand.hbm [shape: f32[2,8,32], index: 17, kind: output, shape index: {}]  }
   0x1   :  { %1730 = sst [smem:[#allocation8_spill]] %s1711_s0 }
   0x2   :  { %1731 = sst [smem:[#allocation9_spill]] %s1712_s1 }
   0x3   :  { %22 = vsyncpa [#allocation3], 0 }
   0x4   :  { %23 = vsyncpa [#allocation4], 0  ;;  %s1732_s26 = sld [smem:[#allocation8_spill]]  ;;  %s1307_s28 = smov [#allocation2]  }
   0x5   :  { %s30_s29 = sshll.u32 %s1307_s28, 4  ;;  %s1308_s0 = smov 128   ;;  %s31_s29 = int_to_ptr.vmem [resolvable:$true] %s30_s29 }
   0x6   :  { %s1309_s30 = smov 8  }
   0xa   :  { %s28_s27 = sshll.u32 %s1732_s26, 4  ;;  %s29_s27 = int_to_ptr.hbm [resolvable:$true] %s28_s27 }
   0xb   :  { %36 = dma.hbm_to_vmem [thread:$0]  %s29_s27, 256, %s31_s29, [#allocation3], %s1308_s0, %s1308_s0, %s1309_s30  }
   0xc   :  { %1303 = dma.done.wait [#allocation3], 256  }
   0xd   :  { %1304 = vsyncadd [#allocation3], 4294967040  ;;  %v116_v0 = vld [vmem:[%s1714_s3 + $0x18] sm:$0xff]  ;;  %v115_v1 = vld [vmem:[%s1714_s3 + $0x10] sm:$0xff]  ;;  %s1733_s23 = sld [smem:[#allocation9_spill]]  ;;  %vm83_vm0 = vcmask 261120  }
   0xe   :  { %133 = vmatpush.msra.mxu2 %v116_v0  ;;  %v114_v3 = vld [vmem:[%s1714_s3 + $0x8] sm:$0xff]  ;;  %v113_v5 = vld [vmem:[%s1714_s3] sm:$0xff]  ;;  %v147_v9 = vld [vmem:[%s1716_s5 + $0x18] sm:$0xff]  ;;  %vm177_vm1 = vcmask 64512   ;;  %s1310_s19 = smov 120   ;;  %s1311_s1 = smov 112  }
   0xf   :  { %v1432_v7 = vld [vmem:[#allocation2] sm:$0xff]  ;;  %v146_v10 = vld [vmem:[%s1716_s5 + $0x10] sm:$0xff]  ;;  %v145_v11 = vld [vmem:[%s1716_s5 + $0x8] sm:$0xff]  ;;  %s1312_s3 = smov 104  }
  0x10   :  { %134 = vmatpush.msra.mxu2 %v115_v1  ;;  %v144_v12 = vld [vmem:[%s1716_s5] sm:$0xff]  ;;  %v1453_v13 = vld [vmem:[#allocation2 + $0x8] sm:$0xff] }
  0x11   :  { %v1204_v14 = vld [vmem:[%s1713_s2] ss:$0 sm:$0xff] }
  0x12   :  { %135 = vmatpush.msra.mxu2 %v114_v3  ;;  %v1203_v16 = vld [vmem:[%s1715_s4] ss:$0 sm:$0xff] }
  0x13   :  { %v78_v2 = vld [vmem:[%s1733_s23 + $0x18] sm:$0xff]  ;;  %v77_v4 = vld [vmem:[%s1733_s23 + $0x10] sm:$0xff]  ;;  %v76_v6 = vld [vmem:[%s1733_s23 + $0x8] sm:$0xff] }
  0x14   :  { %102 = vmatpush.msra.mxu0 %v78_v2  ;;  %v75_v8 = vld [vmem:[%s1733_s23] sm:$0xff]  ;;  %136 = vmatpush.msra.mxu2 %v113_v5 }
  0x15   :  { %1152 = vmatmul.msk.f32.vlgmr.msra.gmra.mxu2 %vm83_vm0, %v1432_v7  ;;  %v1205_v23 = vld [vmem:[%s1717_s6] ss:$0 sm:$0xff] }
  0x16   :  { %103 = vmatpush.msra.mxu0 %v77_v4  ;;  %164 = vmatpush.msrb.mxu2 %v147_v9 }
  0x18   :  { %104 = vmatpush.msra.mxu0 %v76_v6  ;;  %165 = vmatpush.msrb.mxu2 %v146_v10 }
  0x1a   :  { %105 = vmatpush.msra.mxu0 %v75_v8  ;;  %166 = vmatpush.msrb.mxu2 %v145_v11  ;;  %v324_v8 = vld [vmem:[%s1718_s7] sm:$0xff] }
  0x1b   :  { %1150 = vmatmul.msk.f32.vlgmr.msra.gmra.mxu0 %vm83_vm0, %v1432_v7 }
  0x1c   :  { %167 = vmatpush.msrb.mxu2 %v144_v12 }
  0x1d   :  { %1153 = vmatmul.msk.f32.gmra.mxu2 %vm83_vm0, %v1453_v13 }
  0x23   :  { %1151 = vmatmul.msk.f32.gmra.mxu0 %vm83_vm0, %v1453_v13 }
  0x25   :  { %1154 = vmatmul.msk.f32.vlgmr.msrb.gmra.mxu2 %vm83_vm0, %v1432_v7 }
  0x2d   :  { %1155 = vmatmul.msk.f32.gmra.mxu2 %vm83_vm0, %v1453_v13 }
  0x98   :  { %v107_v15 = vpop.f32.mrf.mxu0  ;;  %v138_v18 = vpop.f32.mrf.mxu2 }
  0x99   :  { %v108_v17 = vadd.f32 %v1204_v14, %v107_v15  ;;  %v1469_v19 = vadd.f32 %v1203_v16, %v138_v18 }
  0x9b   :  { %v1471_v20 = vmul.f32 0.35355338, %v108_v17  ;;  %327 = vrot.lane.b32.xlu0 %v1469_v19, %s1310_s19  ;;  %1156 = vmatpush.xpose.msk.msra.mxu3 %vm177_vm1, %v1469_v19 }
  0x9e   :  { %1157 = vmatmul.msk.f32.vlgmr.msra.gmra.mxu3 %vm177_vm1, %v1471_v20 }
  0xa0   :  { %v141_v21 = vpop.f32.mrf.mxu2  ;;  %v110_v27 = vpop.f32.mrf.mxu0 }
  0xa1   :  { %v1479_v22 = vadd.f32 %v1203_v16, %v141_v21  ;;  %v111_v28 = vadd.f32 %v1204_v14, %v110_v27 }
  0xa3   :  { %325 = vrot.lane.b32.xlu0 %v1471_v20, %s1310_s19  ;;  %1158 = vmatpush.xpose.msk.msrb.mxu3 %vm177_vm1, %v1479_v22  ;;  %v1498_v29 = vmul.f32 0.35355338, %v111_v28 }
  0xa6   :  { %1159 = vmatmul.msk.f32.vlgmr.msrb.gmra.mxu3 %vm177_vm1, %v1498_v29 }
  0xa8   :  { %v169_v24 = vpop.f32.mrf.mxu2 }
  0xa9   :  { %v1488_v25 = vadd.f32 %v1205_v23, %v169_v24 }
  0xab   :  { %430 = vrot.lane.b32.xlu0 %v1488_v25, %s1310_s19  ;;  %296 = vmatpush.msra.mxu3 %v1488_v25 }
  0xb0   :  { %v172_v43 = vpop.f32.mrf.mxu2 }
  0xb1   :  { %v1509_v44 = vadd.f32 %v1205_v23, %v172_v43 }
  0xb3   :  { %544 = vrot.lane.b32.xlu0 %v1469_v19, %s1311_s1  ;;  %319 = vmatpush.msrb.mxu0 %v1509_v44 }
  0xbb   :  { %542 = vrot.lane.b32.xlu0 %v1471_v20, %s1311_s1 }
 0x10d   :  { %v328_v26 = vpop.permute.xlu0 %327 }
 0x10e   :  { %1162 = vmatpush.xpose.msk.msra.mxu1 %vm177_vm1, %v328_v26 }
 0x115   :  { %v326_v30 = vpop.permute.xlu0 %325 }
 0x116   :  { %1163 = vmatmul.msk.f32.vlgmr.msra.gmra.mxu1 %vm177_vm1, %v326_v30 }
 0x11d   :  { %v431_v31 = vpop.permute.xlu0 %430 }
 0x11e   :  { %451 = vmatpush.msrb.mxu3 %v431_v31 }
 0x121   :  { %v201_v32 = vpop.f32.mrf.mxu3 }
 0x122   :  { %v230_v33 = vsel %vm177_vm1, %v201_v32, -inf }
 0x123   :  { %231 = vmax.xlane.f32.xlu1 %v230_v33 }
 0x125   :  { %v545_v62 = vpop.permute.xlu0 %544 }
 0x129   :  { %v227_v36 = vpop.f32.mrf.mxu3 }
 0x12a   :  { %v233_v38 = vsel %vm177_vm1, %v227_v36, -inf }
 0x12b   :  { %234 = vmax.xlane.f32.xlu0 %v233_v38 }
 0x12d   :  { %v543_v63 = vpop.permute.xlu0 %542 }
 0x193   :  { %v350_v34 = vpop.f32.mrf.mxu1 }
 0x194   :  { %v381_v35 = vsel %vm177_vm1, %v350_v34, -inf }
 0x195   :  { %382 = vmax.xlane.f32.xlu1 %v381_v35 }
 0x196   :  { %v232_v37 = vpop.xlane.xlu1 %231 }
 0x197   :  { %v236_v39 = vsub.f32 %v201_v32, %v232_v37 }
 0x199   :  { %v238_v40 = vmul.f32 1.442695, %v236_v39 }
 0x19b   :  { %1213 = vpow2.f32 %v238_v40  ;;  %v483_v40 = vld [vmem:[%s1718_s7 + $0x8] sm:$0xff] }
 0x19c   :  { %505 = vmatpush.msrb.mxu1 %v483_v40 }
 0x19e   :  { %v235_v0 = vpop.xlane.xlu0 %234 }
 0x19f   :  { %v237_v1 = vsub.f32 %v227_v36, %v235_v0 }
 0x1a1   :  { %v1214_v41 = vpop.eup %1213  ;;  %v240_v2 = vmul.f32 1.442695, %v237_v1 }
 0x1a2   :  { %v242_v42 = vsel %vm177_vm1, %v1214_v41, 0.0 }
 0x1a3   :  { %243 = vadd.xlane.f32.xlu2 %v242_v42 }
 0x1ae   :  { %355 = vrot.lane.b32.xlu1 %v1479_v22, %s1310_s19 }
 0x208   :  { %v383_v45 = vpop.xlane.xlu1 %382 }
 0x209   :  { %v387_v46 = vsub.f32 %v350_v34, %v383_v45 }
 0x20b   :  { %v389_v47 = vmul.f32 1.442695, %v387_v46 }
 0x20d   :  { %1215 = vpow2.f32 %v389_v47 }
 0x213   :  { %v1216_v48 = vpop.eup %1215 }
 0x214   :  { %v393_v49 = vsel %vm177_vm1, %v1216_v48, 0.0 }
 0x215   :  { %394 = vadd.xlane.f32.xlu2 %v393_v49 }
 0x216   :  { %v244_v50 = vpop.xlane.xlu2 %243 }
 0x217   :  { %1217 = vrcp.f32 %v244_v50  ;;  %v259_v54 = vand.u32 2147483648, %v244_v50  ;;  %v257_v56 = vand.u32 2147483647, %v244_v50  ;;  %vm253_vm3 = vweird.f32 %v244_v50 }
 0x218   :  { %1219 = vpow2.f32 %v240_v2 }
 0x219   :  { %v260_v58 = vor.u32 1.1754944e-38, %v259_v54  ;;  %vm258_vm5 = vcmp.eq.f32.partialorder %v257_v56, 8.507059e+37 }
 0x21d   :  { %v1218_v51 = vpop.eup %1217 }
 0x21e   :  { %v249_v52 = vmul.f32 %v1218_v51, %v244_v50  ;;  %vm254_vm2 = vweird.f32 %v1218_v51  ;;  %v1220_v3 = vpop.eup %1219 }
 0x21f   :  { %vm255_vm4 = vmor %vm253_vm3, %vm254_vm2  ;;  %v245_v4 = vsel %vm177_vm1, %v1220_v3, 0.0 }
 0x220   :  { %v250_v53 = vsub.f32 1.0, %v249_v52  ;;  %v356_v5 = vpop.permute.xlu1 %355 }
 0x221   :  { %1164 = vmatpush.xpose.msk.msra.mxu2 %vm177_vm1, %v356_v5 }
 0x222   :  { %v251_v55 = vmul.f32 %v1218_v51, %v250_v53 }
 0x224   :  { %v252_v57 = vadd.f32 %v1218_v51, %v251_v55 }
 0x225   :  { %534 = vmatpush.msrb.mxu2 %v324_v8 }
 0x226   :  { %v256_v59 = vsel %vm255_vm4, %v1218_v51, %v252_v57 }
 0x227   :  { %v261_v60 = vsel %vm258_vm5, %v260_v58, %v256_v59 }
 0x228   :  { %v262_v61 = vmul.f32 %v1214_v41, %v261_v60 }
 0x22a   :  { %1160 = vmatmul.msk.f32.vlgmr.msra.gmra.mxu3 %vm177_vm1, %v262_v61 }
 0x22b   :  { %1172 = vmatpush.xpose.msk.msra.mxu3 %vm177_vm1, %v545_v62 }
 0x22d   :  { %353 = vrot.lane.b32.xlu2 %v1498_v29, %s1310_s19 }
 0x256   :  { %246 = vadd.xlane.f32.xlu2 %v245_v4 }
 0x288   :  { %v395_v6 = vpop.xlane.xlu2 %394 }
 0x289   :  { %1221 = vrcp.f32 %v395_v6  ;;  %v410_v14 = vand.u32 2147483648, %v395_v6  ;;  %v408_v16 = vand.u32 2147483647, %v395_v6  ;;  %vm404_vm7 = vweird.f32 %v395_v6 }
 0x28b   :  { %v411_v18 = vor.u32 1.1754944e-38, %v410_v14  ;;  %vm409_vm9 = vcmp.eq.f32.partialorder %v408_v16, 8.507059e+37 }
 0x28f   :  { %v1222_v9 = vpop.eup %1221 }
 0x290   :  { %v400_v10 = vmul.f32 %v1222_v9, %v395_v6  ;;  %v354_v11 = vpop.permute.xlu2 %353  ;;  %vm405_vm6 = vweird.f32 %v1222_v9 }
 0x291   :  { %1165 = vmatmul.msk.f32.vlgmr.msra.gmra.mxu2 %vm177_vm1, %v354_v11  ;;  %vm406_vm8 = vmor %vm404_vm7, %vm405_vm6 }
 0x292   :  { %v401_v12 = vsub.f32 1.0, %v400_v10 }
 0x294   :  { %v402_v15 = vmul.f32 %v1222_v9, %v401_v12 }
 0x296   :  { %v403_v17 = vadd.f32 %v1222_v9, %v402_v15 }
 0x298   :  { %v407_v21 = vsel %vm406_vm8, %v1222_v9, %v403_v17 }
 0x299   :  { %v412_v23 = vsel %vm409_vm9, %v411_v18, %v407_v21 }
 0x29a   :  { %v413_v24 = vmul.f32 %v1216_v48, %v412_v23 }
 0x29c   :  { %1166 = vmatmul.msk.f32.vlgmr.msrb.gmra.mxu3 %vm177_vm1, %v413_v24 }
 0x2a4   :  { %1173 = vmatmul.msk.f32.vlgmr.msra.gmra.mxu3 %vm177_vm1, %v543_v63 }
 0x2ad   :  { %v298_v26 = vpop.f32.mrf.mxu3 }
 0x2ae   :  { %1170 = vmatmul.msk.f32.vlgmr.msrb.gmra.mxu2 %vm177_vm1, %v298_v26 }
 0x2c9   :  { %v247_v27 = vpop.xlane.xlu2 %246 }
 0x2ca   :  { %1223 = vrcp.f32 %v247_v27  ;;  %v274_v31 = vand.u32 2147483648, %v247_v27  ;;  %vm268_vm10 = vweird.f32 %v247_v27  ;;  %v272_v33 = vand.u32 2147483647, %v247_v27 }
 0x2cc   :  { %v275_v35 = vor.u32 1.1754944e-38, %v274_v31  ;;  %vm273_vm13 = vcmp.eq.f32.partialorder %v272_v33, 8.507059e+37 }
 0x2d0   :  { %v1224_v28 = vpop.eup %1223 }
 0x2d1   :  { %v264_v30 = vmul.f32 %v1224_v28, %v247_v27  ;;  %vm269_vm11 = vweird.f32 %v1224_v28 }
 0x2d2   :  { %vm270_vm12 = vmor %vm268_vm10, %vm269_vm11 }
 0x2d3   :  { %v265_v32 = vsub.f32 1.0, %v264_v30 }
 0x2d5   :  { %v266_v34 = vmul.f32 %v1224_v28, %v265_v32 }
 0x2d7   :  { %v267_v36 = vadd.f32 %v1224_v28, %v266_v34 }
 0x2d9   :  { %v271_v37 = vsel %vm270_vm12, %v1224_v28, %v267_v36  ;;  %v698_v28 = vld [vmem:[%s1718_s7 + $0x10] sm:$0xff] }
 0x2da   :  { %v276_v38 = vsel %vm273_vm13, %v275_v35, %v271_v37  ;;  %720 = vmatpush.msra.mxu1 %v698_v28 }
 0x2db   :  { %v277_v39 = vmul.f32 %v1220_v3, %v276_v38 }
 0x2dd   :  { %1161 = vmatmul.msk.f32.vlgmr.msrb.gmra.mxu0 %vm177_vm1, %v277_v39 }
 0x314   :  { %v378_v41 = vpop.f32.mrf.mxu2 }
 0x315   :  { %v384_v42 = vsel %vm177_vm1, %v378_v41, -inf }
 0x316   :  { %385 = vmax.xlane.f32.xlu1 %v384_v42 }
 0x31f   :  { %v453_v43 = vpop.f32.mrf.mxu3 }
 0x320   :  { %1168 = vmatmul.msk.f32.vlgmr.msrb.gmra.mxu1 %vm177_vm1, %v453_v43 }
 0x327   :  { %v567_v45 = vpop.f32.mrf.mxu3 }
 0x328   :  { %v598_v46 = vsel %vm177_vm1, %v567_v45, -inf }
 0x329   :  { %599 = vmax.xlane.f32.xlu2 %v598_v46 }
 0x32f   :  { %572 = vrot.lane.b32.xlu1 %v1479_v22, %s1311_s1 }
 0x331   :  { %v1564_v31 = vpop.f32.mrf.mxu2 }
 0x341   :  { %457 = vrot.lane.b32.xlu2 %v1509_v44, %s1310_s19 }
 0x349   :  { %570 = vrot.lane.b32.xlu2 %v1498_v29, %s1311_s1 }
 0x351   :  { %758 = vrot.lane.b32.xlu2 %v1498_v29, %s1312_s3 }
 0x35a   :  { %v321_v47 = vpop.f32.mrf.mxu0 }
 0x35b   :  { %1171 = vmatmul.msk.f32.gmra.mxu2 %vm177_vm1, %v321_v47 }
 0x389   :  { %v386_v48 = vpop.xlane.xlu1 %385 }
 0x38a   :  { %v388_v49 = vsub.f32 %v378_v41, %v386_v48 }
 0x38c   :  { %v391_v50 = vmul.f32 1.442695, %v388_v49 }
 0x38e   :  { %1225 = vpow2.f32 %v391_v50 }
 0x394   :  { %v1226_v51 = vpop.eup %1225 }
 0x395   :  { %v396_v52 = vsel %vm177_vm1, %v1226_v51, 0.0 }
 0x396   :  { %397 = vadd.xlane.f32.xlu0 %v396_v52 }
 0x39c   :  { %v600_v53 = vpop.xlane.xlu2 %599 }
 0x39d   :  { %v604_v54 = vsub.f32 %v567_v45, %v600_v53 }
 0x39f   :  { %v606_v55 = vmul.f32 1.442695, %v604_v54 }
 0x3a1   :  { %1227 = vpow2.f32 %v606_v55  ;;  %v573_v57 = vpop.permute.xlu1 %572 }
 0x3a4   :  { %v458_v56 = vpop.permute.xlu2 %457 }
 0x3a5   :  { %478 = vmatpush.msra.mxu0 %v458_v56  ;;  %v1198_v56 = vpack.i.bf16 %v1509_v44, %v1488_v25 }
 0x3a7   :  { %1174 = vmatpush.xpose.msk.msrb.mxu0 %vm177_vm1, %v573_v57  ;;  %v1228_v29 = vpop.eup %1227 }
 0x3a8   :  { %v610_v58 = vsel %vm177_vm1, %v1228_v29, 0.0 }
 0x3a9   :  { %611 = vadd.xlane.f32.xlu1 %v610_v58 }
 0x3aa   :  { %646 = vrot.lane.b32.xlu0 %v1488_v25, %s1311_s1 }
 0x3ac   :  { %v571_v8 = vpop.permute.xlu2 %570 }
 0x3b2   :  { %732 = vrot.lane.b32.xlu0 %v1469_v19, %s1312_s3 }
 0x3b4   :  { %v759_v27 = vpop.permute.xlu2 %758 }
 0x3ba   :  { %730 = vrot.lane.b32.xlu0 %v1471_v20, %s1312_s3 }
 0x3c2   :  { %760 = vrot.lane.b32.xlu1 %v1479_v22, %s1312_s3 }
 0x3de   :  { %v1567_v34 = vpop.f32.mrf.mxu2 }
 0x409   :  { %v398_v59 = vpop.xlane.xlu0 %397 }
 0x40a   :  { %1229 = vrcp.f32 %v398_v59  ;;  %v425_v63 = vand.u32 2147483648, %v398_v59  ;;  %v423_v1 = vand.u32 2147483647, %v398_v59  ;;  %vm419_vm15 = vweird.f32 %v398_v59 }
 0x40c   :  { %v426_v3 = vor.u32 1.1754944e-38, %v425_v63  ;;  %vm424_vm3 = vcmp.eq.f32.partialorder %v423_v1, 8.507059e+37 }
 0x410   :  { %v1230_v60 = vpop.eup %1229 }
 0x411   :  { %v415_v61 = vmul.f32 %v1230_v60, %v398_v59  ;;  %vm420_vm14 = vweird.f32 %v1230_v60 }
 0x412   :  { %vm421_vm2 = vmor %vm419_vm15, %vm420_vm14 }
 0x413   :  { %v416_v62 = vsub.f32 1.0, %v415_v61 }
 0x415   :  { %v417_v0 = vmul.f32 %v1230_v60, %v416_v62 }
 0x417   :  { %v418_v2 = vadd.f32 %v1230_v60, %v417_v0 }
 0x419   :  { %v422_v19 = vsel %vm421_vm2, %v1230_v60, %v418_v2 }
 0x41a   :  { %v427_v4 = vsel %vm424_vm3, %v426_v3, %v422_v19 }
 0x41b   :  { %v428_v20 = vmul.f32 %v1226_v51, %v427_v4 }
 0x41c   :  { %v612_v5 = vpop.xlane.xlu1 %611  ;;  %v647_v6 = vpop.permute.xlu0 %646 }
 0x41d   :  { %1231 = vrcp.f32 %v612_v5  ;;  %1167 = vmatmul.msk.f32.vlgmr.msra.gmra.mxu0 %vm177_vm1, %v428_v20  ;;  %667 = vmatpush.msrb.mxu3 %v647_v6  ;;  %v627_v12 = vand.u32 2147483648, %v612_v5  ;;  %v625_v15 = vand.u32 2147483647, %v612_v5  ;;  %vm621_vm5 = vweird.f32 %v612_v5 }
 0x41f   :  { %v628_v17 = vor.u32 1.1754944e-38, %v627_v12  ;;  %vm626_vm7 = vcmp.eq.f32.partialorder %v625_v15, 8.507059e+37 }
 0x423   :  { %v1232_v22 = vpop.eup %1231 }
 0x424   :  { %v617_v9 = vmul.f32 %v1232_v22, %v612_v5  ;;  %v733_v10 = vpop.permute.xlu0 %732  ;;  %vm622_vm4 = vweird.f32 %v1232_v22 }
 0x425   :  { %1175 = vmatmul.msk.f32.vlgmr.msrb.gmra.mxu0 %vm177_vm1, %v571_v8  ;;  %1180 = vmatpush.xpose.msk.msra.mxu2 %vm177_vm1, %v733_v10  ;;  %vm623_vm6 = vmor %vm621_vm5, %vm622_vm4 }
 0x426   :  { %v618_v11 = vsub.f32 1.0, %v617_v9 }
 0x428   :  { %v619_v14 = vmul.f32 %v1232_v22, %v618_v11 }
 0x42a   :  { %v620_v16 = vadd.f32 %v1232_v22, %v619_v14 }
 0x42c   :  { %v624_v18 = vsel %vm623_vm6, %v1232_v22, %v620_v16  ;;  %v731_v21 = vpop.permute.xlu0 %730 }
 0x42d   :  { %v629_v23 = vsel %vm626_vm7, %v628_v17, %v624_v18  ;;  %1181 = vmatmul.msk.f32.vlgmr.msra.gmra.mxu2 %vm177_vm1, %v731_v21 }
 0x42e   :  { %v630_v24 = vmul.f32 %v1228_v29, %v629_v23 }
 0x430   :  { %1176 = vmatmul.msk.f32.vlgmr.msrb.gmra.mxu3 %vm177_vm1, %v630_v24 }
 0x434   :  { %v761_v26 = vpop.permute.xlu1 %760 }
 0x435   :  { %1182 = vmatpush.xpose.msk.msra.mxu3 %vm177_vm1, %v761_v26 }
 0x438   :  { %1183 = vmatmul.msk.f32.vlgmr.msra.gmra.mxu3 %vm177_vm1, %v759_v27 }
 0x49a   :  { %v480_v30 = vpop.f32.mrf.mxu0 }
 0x49b   :  { %1169 = vmatmul.msk.f32.gmra.mxu1 %vm177_vm1, %v480_v30 }
 0x4a2   :  { %v595_v32 = vpop.f32.mrf.mxu0 }
 0x4a3   :  { %v601_v33 = vsel %vm177_vm1, %v595_v32, -inf }
 0x4a4   :  { %602 = vmax.xlane.f32.xlu1 %v601_v33 }
 0x4b0   :  { %v755_v35 = vpop.f32.mrf.mxu2 }
 0x4b1   :  { %v786_v36 = vsel %vm177_vm1, %v755_v35, -inf }
 0x4b2   :  { %787 = vmax.xlane.f32.xlu0 %v786_v36  ;;  %v886_v36 = vld [vmem:[%s1718_s7 + $0x18] sm:$0xff] }
 0x4b3   :  { %v669_v37 = vpop.f32.mrf.mxu3  ;;  %908 = vmatpush.msrb.mxu3 %v886_v36 }
 0x4b4   :  { %1178 = vmatmul.msk.f32.vlgmr.msra.gmra.mxu1 %vm177_vm1, %v669_v37 }
 0x4bb   :  { %v783_v38 = vpop.f32.mrf.mxu3 }
 0x4bc   :  { %v789_v39 = vsel %vm177_vm1, %v783_v38, -inf }
 0x4bd   :  { %790 = vmax.xlane.f32.xlu2 %v789_v39 }
 0x517   :  { %v603_v40 = vpop.xlane.xlu1 %602 }
 0x518   :  { %v605_v41 = vsub.f32 %v595_v32, %v603_v40  ;;  %v507_v40 = vpop.f32.mrf.mxu1 }
 0x51a   :  { %v608_v42 = vmul.f32 1.442695, %v605_v41 }
 0x51c   :  { %1233 = vpow2.f32 %v608_v42 }
 0x520   :  { %v510_v41 = vpop.f32.mrf.mxu1 }
 0x522   :  { %v1234_v43 = vpop.eup %1233 }
 0x523   :  { %v613_v45 = vsel %vm177_vm1, %v1234_v43, 0.0 }
 0x524   :  { %614 = vadd.xlane.f32.xlu1 %v613_v45 }
 0x525   :  { %v788_v46 = vpop.xlane.xlu0 %787 }
 0x526   :  { %v792_v47 = vsub.f32 %v755_v35, %v788_v46  ;;  %v1206_v46 = vld [vmem:[%s1719_s8] ss:$0 sm:$0xff] }
 0x528   :  { %v794_v48 = vmul.f32 1.442695, %v792_v47 }
 0x52a   :  { %1235 = vpow2.f32 %v794_v48 }
 0x530   :  { %v1236_v49 = vpop.eup %1235  ;;  %v791_v50 = vpop.xlane.xlu2 %790 }
 0x531   :  { %v793_v51 = vsub.f32 %v783_v38, %v791_v50  ;;  %v798_v52 = vsel %vm177_vm1, %v1236_v49, 0.0  ;;  %v722_v42 = vpop.f32.mrf.mxu1 }
 0x532   :  { %799 = vadd.xlane.f32.xlu0 %v798_v52 }
 0x533   :  { %v796_v53 = vmul.f32 1.442695, %v793_v51 }
 0x535   :  { %1237 = vpow2.f32 %v796_v53  ;;  %v540_v53 = vadd.f32 %v1567_v34, %v510_v41 }
 0x53b   :  { %v1574_v54 = vpop.eup %1237 }
 0x53c   :  { %v801_v55 = vsel %vm177_vm1, %v1574_v54, 0.0 }
 0x53d   :  { %672 = vrot.lane.b32.xlu1 %v1509_v44, %s1311_s1  ;;  %802 = vadd.xlane.f32.xlu2 %v801_v55 }
 0x546   :  { %1199 = vrot.lane.b32.xlu0 %v1198_v56, %s1312_s3 }
 0x597   :  { %v615_v57 = vpop.xlane.xlu1 %614 }
 0x598   :  { %1239 = vrcp.f32 %v615_v57  ;;  %v642_v63 = vand.u32 2147483648, %v615_v57  ;;  %vm636_vm9 = vweird.f32 %v615_v57  ;;  %v640_v0 = vand.u32 2147483647, %v615_v57 }
 0x59a   :  { %v643_v2 = vor.u32 1.1754944e-38, %v642_v63  ;;  %vm641_vm11 = vcmp.eq.f32.partialorder %v640_v0, 8.507059e+37 }
 0x59e   :  { %v1240_v29 = vpop.eup %1239 }
 0x59f   :  { %v632_v58 = vmul.f32 %v1240_v29, %v615_v57  ;;  %vm637_vm8 = vweird.f32 %v1240_v29 }
 0x5a0   :  { %vm638_vm10 = vmor %vm636_vm9, %vm637_vm8 }
 0x5a1   :  { %v633_v59 = vsub.f32 1.0, %v632_v58  ;;  %v1313_v58 = vmov 32.0  }
 0x5a3   :  { %v634_v60 = vmul.f32 %v1240_v29, %v633_v59 }
 0x5a5   :  { %v635_v61 = vadd.f32 %v1240_v29, %v634_v60  ;;  %v800_v62 = vpop.xlane.xlu0 %799 }
 0x5a6   :  { %1241 = vrcp.f32 %v800_v62  ;;  %v815_v22 = vand.u32 2147483648, %v800_v62  ;;  %v813_v8 = vand.u32 2147483647, %v800_v62  ;;  %vm809_vm13 = vweird.f32 %v800_v62 }
 0x5a7   :  { %v639_v1 = vsel %vm638_vm10, %v1240_v29, %v635_v61 }
 0x5a8   :  { %v644_v44 = vsel %vm641_vm11, %v643_v2, %v639_v1  ;;  %v816_v11 = vor.u32 1.1754944e-38, %v815_v22  ;;  %vm814_vm15 = vcmp.eq.f32.partialorder %v813_v8, 8.507059e+37  ;;  %v989_v22 = vld [vmem:[%s1722_s11] sm:$0xff] }
 0x5a9   :  { %v645_v20 = vmul.f32 %v1234_v43, %v644_v44  ;;  %v537_v43 = vadd.f32 %v1564_v31, %v507_v40 }
 0x5ab   :  { %v728_v45 = vadd.f32 %v722_v42, %v537_v43  ;;  %v1035_v42 = vld [vmem:[%s1724_s13 + $0x38] sm:$0xff] }
 0x5ac   :  { %v1242_v25 = vpop.eup %1241 }
 0x5ad   :  { %v805_v3 = vmul.f32 %v1242_v25, %v800_v62  ;;  %vm810_vm12 = vweird.f32 %v1242_v25 }
 0x5ae   :  { %vm811_vm14 = vmor %vm809_vm13, %vm810_vm12 }
 0x5af   :  { %v806_v19 = vsub.f32 1.0, %v805_v3  ;;  %v673_v4 = vpop.permute.xlu1 %672 }
 0x5b0   :  { %693 = vmatpush.msra.mxu0 %v673_v4  ;;  %v803_v5 = vpop.xlane.xlu2 %802 }
 0x5b1   :  { %v807_v6 = vmul.f32 %v1242_v25, %v806_v19  ;;  %1243 = vrcp.f32 %v803_v5  ;;  %1177 = vmatmul.msk.f32.vlgmr.msra.gmra.mxu0 %vm177_vm1, %v645_v20  ;;  %v830_v24 = vand.u32 2147483648, %v803_v5  ;;  %v828_v27 = vand.u32 2147483647, %v803_v5  ;;  %v992_v20 = vld [vmem:[%s1722_s11 + $0x18] sm:$0xff] }
 0x5b2   :  { %vm824_vm3 = vweird.f32 %v803_v5  ;;  %1245 = vrcp.f32 %v1313_v58  ;;  %v1028_v58 = vld [vmem:[%s1724_s13] sm:$0xff] }
 0x5b3   :  { %v808_v9 = vadd.f32 %v1242_v25, %v807_v6  ;;  %v831_v30 = vor.u32 1.1754944e-38, %v830_v24  ;;  %vm829_vm5 = vcmp.eq.f32.partialorder %v828_v27, 8.507059e+37  ;;  %v990_v6 = vld [vmem:[%s1722_s11 + $0x8] sm:$0xff]  ;;  %v1039_v27 = vld [vmem:[%s1724_s13 + $0x58] sm:$0xff] }
 0x5b5   :  { %v812_v10 = vsel %vm811_vm14, %v1242_v25, %v808_v9 }
 0x5b6   :  { %v817_v14 = vsel %vm814_vm15, %v816_v11, %v812_v10 }
 0x5b7   :  { %v1244_v12 = vpop.eup %1243  ;;  %v818_v23 = vmul.f32 %v1236_v49, %v817_v14  ;;  %v1042_v14 = vld [vmem:[%s1724_s13 + $0x70] sm:$0xff] }
 0x5b8   :  { %v820_v15 = vmul.f32 %v1244_v12, %v803_v5  ;;  %v1200_v16 = vpop.permute.xlu0 %1199  ;;  %vm825_vm2 = vweird.f32 %v1244_v12  ;;  %v1246_v59 = vpop.eup %1245  ;;  %v991_v5 = vld [vmem:[%s1722_s11 + $0x10] sm:$0xff] }
 0x5b9   :  { %v1202_v17 = vunpack.i.h.bf16 %v1200_v16  ;;  %v1201_v18 = vunpack.i.l.bf16 %v1200_v16  ;;  %vm826_vm4 = vmor %vm824_vm3, %vm825_vm2  ;;  %v935_v60 = vmul.f32 32.0, %v1246_v59  ;;  %v1041_v16 = vld [vmem:[%s1724_s13 + $0x68] sm:$0xff] }
 0x5ba   :  { %v821_v21 = vsub.f32 1.0, %v820_v15 }
 0x5bb   :  { %855 = vmatpush.msrb.mxu0 %v1201_v18  ;;  %881 = vmatpush.msrb.mxu2 %v1202_v17 }
 0x5bc   :  { %v822_v26 = vmul.f32 %v1244_v12, %v821_v21  ;;  %1184 = vmatmul.msk.f32.vlgmr.msrb.gmra.mxu0 %vm177_vm1, %v818_v23  ;;  %v1040_v23 = vld [vmem:[%s1724_s13 + $0x60] sm:$0xff] }
 0x5bd   :  { %1015 = vmatpush.msra.mxu0 %v992_v20 }
 0x5be   :  { %v823_v28 = vadd.f32 %v1244_v12, %v822_v26 }
 0x5bf   :  { %1016 = vmatpush.msra.mxu0 %v991_v5 }
 0x5c0   :  { %v827_v32 = vsel %vm826_vm4, %v1244_v12, %v823_v28  ;;  %v1043_v12 = vld [vmem:[%s1724_s13 + $0x78] sm:$0xff] }
 0x5c1   :  { %v832_v33 = vsel %vm829_vm5, %v831_v30, %v827_v32  ;;  %1017 = vmatpush.msra.mxu0 %v990_v6  ;;  %1048 = vmatpush.msrb.mxu1 %v1043_v12  ;;  %v1038_v30 = vld [vmem:[%s1724_s13 + $0x50] sm:$0xff] }
 0x5c2   :  { %v833_v35 = vmul.f32 %v1574_v54, %v832_v33  ;;  %v1207_v33 = vld [vmem:[%s1720_s9] ss:$0 sm:$0xff] }
 0x5c3   :  { %1018 = vmatpush.msra.mxu0 %v989_v22  ;;  %1049 = vmatpush.msrb.mxu1 %v1042_v14 }
 0x5c4   :  { %1185 = vmatmul.msk.f32.vlgmr.msrb.gmra.mxu2 %vm177_vm1, %v833_v35  ;;  %v1037_v35 = vld [vmem:[%s1724_s13 + $0x48] sm:$0xff] }
 0x5c5   :  { %1050 = vmatpush.msrb.mxu1 %v1041_v16 }
 0x5c7   :  { %1051 = vmatpush.msrb.mxu1 %v1040_v23 }
 0x5c9   :  { %1052 = vmatpush.msrb.mxu1 %v1039_v27 }
 0x5cb   :  { %1053 = vmatpush.msrb.mxu1 %v1038_v30 }
 0x5cd   :  { %1054 = vmatpush.msrb.mxu1 %v1037_v35  ;;  %v1211_v35 = vld [vmem:[%s1726_s15] ss:$0 sm:$0xff]  ;;  %s1314_s15 = smov [#allocation5]  }
 0x5ce   :  { %s1135_s19 = sshll.u32 %s1314_s15, 4  ;;  %s1136_s19 = int_to_ptr.vmem [resolvable:$true] %s1135_s19 }
 0x62e   :  { %v695_v37 = vpop.f32.mrf.mxu0 }
 0x62f   :  { %1179 = vmatmul.msk.f32.gmra.mxu1 %vm177_vm1, %v695_v37 }
 0x639   :  { %v857_v38 = vpop.f32.mrf.mxu0 }
 0x63a   :  { %1186 = vmatmul.msk.f32.vlgmr.msrb.gmra.mxu3 %vm177_vm1, %v857_v38  ;;  %v1208_v38 = vld [vmem:[%s1721_s10] ss:$0 sm:$0xff] }
 0x647   :  { %v883_v39 = vpop.f32.mrf.mxu2 }
 0x648   :  { %1187 = vmatmul.msk.f32.gmra.mxu3 %vm177_vm1, %v883_v39  ;;  %vm939_vm1 = vweird.f32 %v1246_v59  ;;  %v1036_v39 = vld [vmem:[%s1724_s13 + $0x40] sm:$0xff] }
 0x649   :  { %1055 = vmatpush.msrb.mxu1 %v1036_v39 }
 0x64b   :  { %1056 = vmatpush.msrb.mxu1 %v1035_v42 }
 0x6ac   :  { %v725_v52 = vpop.f32.mrf.mxu1 }
 0x6ad   :  { %v729_v54 = vadd.f32 %v725_v52, %v540_v53  ;;  %v1031_v52 = vld [vmem:[%s1724_s13 + $0x18] sm:$0xff] }
 0x6bd   :  { %v910_v47 = vpop.f32.mrf.mxu3 }
 0x6be   :  { %v916_v48 = vadd.f32 %v910_v47, %v728_v45 }
 0x6c0   :  { %v922_v49 = vadd.f32 %v1206_v46, %v916_v48  ;;  %v1033_v48 = vld [vmem:[%s1724_s13 + $0x28] sm:$0xff] }
 0x6c2   :  { %v924_v50 = vadd.f32 %v922_v49, %v1432_v7  ;;  %v936_v7 = vsub.f32 1.0, %v935_v60 }
 0x6c4   :  { %v928_v51 = vsel %vm83_vm0, %v924_v50, 0.0  ;;  %v937_v61 = vmul.f32 %v1246_v59, %v936_v7 }
 0x6c5   :  { %929 = vadd.xlane.f32.xlu2 %v928_v51 }
 0x6c6   :  { %v938_v62 = vadd.f32 %v1246_v59, %v937_v61 }
 0x6c8   :  { %v1602_v63 = vsel %vm939_vm1, %v1246_v59, %v938_v62  ;;  %v1209_v59 = vld [vmem:[%s1723_s12] ss:$0 sm:$0xff] }
 0x6cb   :  { %v913_v55 = vpop.f32.mrf.mxu3 }
 0x6cc   :  { %v917_v56 = vadd.f32 %v913_v55, %v729_v54 }
 0x6ce   :  { %v923_v31 = vadd.f32 %v1206_v46, %v917_v56  ;;  %v1034_v46 = vld [vmem:[%s1724_s13 + $0x30] sm:$0xff] }
 0x6cf   :  { %1057 = vmatpush.msrb.mxu1 %v1034_v46 }
 0x6d0   :  { %v925_v57 = vadd.f32 %v923_v31, %v1453_v13 }
 0x6d1   :  { %1058 = vmatpush.msrb.mxu1 %v1033_v48 }
 0x6d2   :  { %v931_v29 = vsel %vm83_vm0, %v925_v57, 0.0 }
 0x6d3   :  { %932 = vadd.xlane.f32.xlu2 %v931_v29  ;;  %v1029_v29 = vld [vmem:[%s1724_s13 + $0x8] sm:$0xff] }
 0x738   :  { %v930_v34 = vpop.xlane.xlu2 %929 }
 0x739   :  { %v941_v0 = vmul.f32 %v1602_v63, %v930_v34 }
 0x73b   :  { %v943_v1 = vsub.f32 %v924_v50, %v941_v0  ;;  %v1032_v50 = vld [vmem:[%s1724_s13 + $0x20] sm:$0xff] }
 0x73c   :  { %1059 = vmatpush.msrb.mxu1 %v1032_v50 }
 0x73d   :  { %v945_v2 = vmul.f32 %v943_v1, %v943_v1 }
 0x73e   :  { %1060 = vmatpush.msrb.mxu1 %v1031_v52 }
 0x73f   :  { %v947_v13 = vsel %vm83_vm0, %v945_v2, 0.0 }
 0x740   :  { %948 = vadd.xlane.f32.xlu2 %v947_v13 }
 0x746   :  { %v933_v25 = vpop.xlane.xlu2 %932 }
 0x747   :  { %v942_v44 = vmul.f32 %v1602_v63, %v933_v25 }
 0x749   :  { %v1607_v3 = vsub.f32 %v925_v57, %v942_v44  ;;  %v1030_v57 = vld [vmem:[%s1724_s13 + $0x10] sm:$0xff] }
 0x74a   :  { %1061 = vmatpush.msrb.mxu1 %v1030_v57 }
 0x74b   :  { %v946_v19 = vmul.f32 %v1607_v3, %v1607_v3 }
 0x74c   :  { %1062 = vmatpush.msrb.mxu1 %v1029_v29 }
 0x74d   :  { %v950_v4 = vsel %vm83_vm0, %v946_v19, 0.0 }
 0x74e   :  { %951 = vadd.xlane.f32.xlu0 %v950_v4  ;;  %1063 = vmatpush.msrb.mxu1 %v1028_v58 }
 0x7b3   :  { %v949_v8 = vpop.xlane.xlu2 %948 }
 0x7b4   :  { %v953_v9 = vmul.f32 %v949_v8, %v1602_v63 }
 0x7b6   :  { %v955_v10 = vadd.f32 1e-05, %v953_v9 }
 0x7b8   :  { %1247 = vrsqrt.f32 %v955_v10  ;;  %vm963_vm7 = vweird.f32 %v955_v10 }
 0x7be   :  { %v1248_v11 = vpop.eup %1247 }
 0x7bf   :  { %v958_v15 = vmul.f32 %v1248_v11, %v955_v10  ;;  %vm964_vm6 = vweird.f32 %v1248_v11 }
 0x7c0   :  { %vm965_vm8 = vmor %vm963_vm7, %vm964_vm6 }
 0x7c1   :  { %v959_v17 = vmul.f32 %v1248_v11, %v958_v15  ;;  %v952_v18 = vpop.xlane.xlu0 %951 }
 0x7c2   :  { %v954_v21 = vmul.f32 %v952_v18, %v1602_v63 }
 0x7c3   :  { %v960_v24 = vmul.f32 0.5, %v959_v17 }
 0x7c4   :  { %v956_v26 = vadd.f32 1e-05, %v954_v21 }
 0x7c5   :  { %v961_v28 = vsub.f32 1.5, %v960_v24 }
 0x7c6   :  { %1249 = vrsqrt.f32 %v956_v26  ;;  %vm973_vm10 = vweird.f32 %v956_v26 }
 0x7c7   :  { %v962_v32 = vmul.f32 %v1248_v11, %v961_v28 }
 0x7c9   :  { %v966_v36 = vsel %vm965_vm8, %v1248_v11, %v962_v32 }
 0x7ca   :  { %v977_v37 = vmul.f32 %v966_v36, %v943_v1  ;;  %v1210_v1 = vld [vmem:[%s1725_s14] ss:$0 sm:$0xff] }
 0x7cc   :  { %v1250_v40 = vpop.eup %1249  ;;  %v982_v41 = vmul.f32 %v1207_v33, %v977_v37 }
 0x7cd   :  { %v968_v43 = vmul.f32 %v1250_v40, %v956_v26  ;;  %vm974_vm9 = vweird.f32 %v1250_v40 }
 0x7ce   :  { %v987_v45 = vadd.f32 %v1208_v38, %v982_v41  ;;  %vm975_vm11 = vmor %vm973_vm10, %vm974_vm9 }
 0x7cf   :  { %v969_v47 = vmul.f32 %v1250_v40, %v968_v43 }
 0x7d0   :  { %1188 = vmatmul.msk.f32.vlgmr.msra.gmra.mxu0 %vm83_vm0, %v987_v45 }
 0x7d1   :  { %v970_v49 = vmul.f32 0.5, %v969_v47 }
 0x7d3   :  { %v971_v51 = vsub.f32 1.5, %v970_v49 }
 0x7d5   :  { %v972_v53 = vmul.f32 %v1250_v40, %v971_v51 }
 0x7d7   :  { %v976_v54 = vsel %vm975_vm11, %v1250_v40, %v972_v53 }
 0x7d8   :  { %v978_v55 = vmul.f32 %v976_v54, %v1607_v3 }
 0x7da   :  { %v983_v56 = vmul.f32 %v1207_v33, %v978_v55 }
 0x7dc   :  { %v988_v31 = vadd.f32 %v1208_v38, %v983_v56  ;;  %v1212_v38 = vld [vmem:[%s1727_s16] ss:$0 sm:$0xff]  ;;  %s1137_s16 = sshll.u32 %s1728_s17, 4  ;;  %s1138_s16 = int_to_ptr.hbm [resolvable:$true] %s1137_s16 }
 0x7de   :  { %1189 = vmatmul.msk.f32.gmra.mxu0 %vm83_vm0, %v988_v31 }
 0x84d   :  { %v1020_v60 = vpop.f32.mrf.mxu0 }
 0x84e   :  { %v1021_v7 = vadd.f32 %v1209_v59, %v1020_v60 }
 0x850   :  { %v1026_v61 = vmax.f32 %v1021_v7, 0.0 }
 0x852   :  { %1064 = vmatmul.f32.vlgmr.msrb.gmra.mxu1 %v1026_v61 }
 0x85b   :  { %v1023_v62 = vpop.f32.mrf.mxu0 }
 0x85c   :  { %v1024_v34 = vadd.f32 %v1209_v59, %v1023_v62 }
 0x85e   :  { %v1027_v0 = vmax.f32 %v1024_v34, 0.0 }
 0x860   :  { %1067 = vmatmul.f32.gmra.mxu1 %v1027_v0 }
 0x8cf   :  { %v1065_v2 = vpop.f32.mrf.mxu1 }
 0x8d0   :  { %v1066_v13 = vadd.f32 %v1210_v1, %v1065_v2 }
 0x8d2   :  { %v1071_v25 = vadd.f32 %v1066_v13, %v987_v45 }
 0x8d4   :  { %v1075_v44 = vsel %vm83_vm0, %v1071_v25, 0.0 }
 0x8d5   :  { %1076 = vadd.xlane.f32.xlu1 %v1075_v44 }
 0x8dd   :  { %v1068_v3 = vpop.f32.mrf.mxu1 }
 0x8de   :  { %v1069_v19 = vadd.f32 %v1210_v1, %v1068_v3 }
 0x8e0   :  { %v1072_v4 = vadd.f32 %v1069_v19, %v988_v31 }
 0x8e2   :  { %v1078_v20 = vsel %vm83_vm0, %v1072_v4, 0.0 }
 0x8e3   :  { %1079 = vadd.xlane.f32.xlu2 %v1078_v20 }
 0x948   :  { %v1077_v5 = vpop.xlane.xlu1 %1076 }
 0x949   :  { %v1081_v6 = vmul.f32 %v1077_v5, %v1602_v63 }
 0x94b   :  { %v1083_v22 = vsub.f32 %v1071_v25, %v1081_v6 }
 0x94d   :  { %v1085_v8 = vmul.f32 %v1083_v22, %v1083_v22 }
 0x94f   :  { %v1087_v9 = vsel %vm83_vm0, %v1085_v8, 0.0 }
 0x950   :  { %1088 = vadd.xlane.f32.xlu2 %v1087_v9 }
 0x956   :  { %v1080_v10 = vpop.xlane.xlu2 %1079 }
 0x957   :  { %v1082_v11 = vmul.f32 %v1080_v10, %v1602_v63 }
 0x959   :  { %v1084_v12 = vsub.f32 %v1072_v4, %v1082_v11 }
 0x95b   :  { %v1086_v14 = vmul.f32 %v1084_v12, %v1084_v12 }
 0x95d   :  { %v1090_v15 = vsel %vm83_vm0, %v1086_v14, 0.0 }
 0x95e   :  { %1091 = vadd.xlane.f32.xlu2 %v1090_v15 }
 0x9c3   :  { %v1089_v16 = vpop.xlane.xlu2 %1088 }
 0x9c4   :  { %v1093_v17 = vmul.f32 %v1089_v16, %v1602_v63 }
 0x9c6   :  { %v1095_v18 = vadd.f32 1e-05, %v1093_v17 }
 0x9c8   :  { %1251 = vrsqrt.f32 %v1095_v18  ;;  %vm1103_vm13 = vweird.f32 %v1095_v18 }
 0x9ce   :  { %v1252_v21 = vpop.eup %1251 }
 0x9cf   :  { %v1098_v23 = vmul.f32 %v1252_v21, %v1095_v18  ;;  %vm1104_vm12 = vweird.f32 %v1252_v21 }
 0x9d0   :  { %vm1105_vm14 = vmor %vm1103_vm13, %vm1104_vm12 }
 0x9d1   :  { %v1099_v24 = vmul.f32 %v1252_v21, %v1098_v23  ;;  %v1092_v26 = vpop.xlane.xlu2 %1091 }
 0x9d2   :  { %v1094_v27 = vmul.f32 %v1092_v26, %v1602_v63 }
 0x9d3   :  { %v1100_v28 = vmul.f32 0.5, %v1099_v24 }
 0x9d4   :  { %v1096_v30 = vadd.f32 1e-05, %v1094_v27 }
 0x9d5   :  { %v1101_v32 = vsub.f32 1.5, %v1100_v28 }
 0x9d6   :  { %1253 = vrsqrt.f32 %v1096_v30  ;;  %vm1113_vm2 = vweird.f32 %v1096_v30 }
 0x9d7   :  { %v1102_v33 = vmul.f32 %v1252_v21, %v1101_v32 }
 0x9d9   :  { %v1106_v36 = vsel %vm1105_vm14, %v1252_v21, %v1102_v33 }
 0x9da   :  { %v1117_v37 = vmul.f32 %v1106_v36, %v1083_v22 }
 0x9dc   :  { %v1254_v39 = vpop.eup %1253  ;;  %v1122_v63 = vmul.f32 %v1211_v35, %v1117_v37 }
 0x9dd   :  { %v1108_v40 = vmul.f32 %v1254_v39, %v1096_v30  ;;  %vm1114_vm15 = vweird.f32 %v1254_v39 }
 0x9de   :  { %v1127_v41 = vadd.f32 %v1212_v38, %v1122_v63  ;;  %vm1115_vm3 = vmor %vm1113_vm2, %vm1114_vm15 }
 0x9df   :  { %v1109_v42 = vmul.f32 %v1254_v39, %v1108_v40 }
 0x9e0   :  { %1129 = vst.msk [vmem:[#allocation5] sm:$0xff] %vm83_vm0, %v1127_v41 }
 0x9e1   :  { %v1110_v43 = vmul.f32 0.5, %v1109_v42 }
 0x9e3   :  { %v1111_v45 = vsub.f32 1.5, %v1110_v43 }
 0x9e5   :  { %v1112_v46 = vmul.f32 %v1254_v39, %v1111_v45 }
 0x9e7   :  { %v1116_v47 = vsel %vm1115_vm3, %v1254_v39, %v1112_v46 }
 0x9e8   :  { %v1118_v48 = vmul.f32 %v1116_v47, %v1084_v12 }
 0x9ea   :  { %v1123_v49 = vmul.f32 %v1211_v35, %v1118_v48 }
 0x9ec   :  { %v1128_v50 = vadd.f32 %v1212_v38, %v1123_v49 }
 0x9ee   :  { %1130 = vst.msk [vmem:[#allocation5 + $0x8] sm:$0xff] %vm83_vm0, %v1128_v50 }
 0x9ef   :  { %1143 = dma.vmem_to_hbm [thread:$0]  %s1136_s19, 256, %s1138_s16, [#allocation4], %s1308_s0, %s1308_s0, %s1309_s30  }
 0x9f0   :  { %1305 = dma.done.wait [#allocation4], 256  }
 0x9f1   :  { %1306 = vsyncadd [#allocation4], 4294967040 }
 0x9f2   :  { %1148 = vsyncpa [#allocation3], 1 }
 0x9f3   :  { %1149 = vsyncpa [#allocation4], 1 }

</bundles_post_ra>
